<compile_context>
chip_gen: v5e
topology: v5e:2x2
jax: 0.10.0
libtpu: 0.0.40
codegen_flags: <defaults>
</compile_context>

<pallas_src>
import functools
import math

import jax
import jax.numpy as jnp
from jax.experimental import pallas as pl
from jax.experimental.pallas import tpu as pltpu


def _layer_norm(x, w, b, eps=1e-5):
    mu = jnp.mean(x, axis=-1, keepdims=True)
    var = jnp.mean((x - mu) ** 2, axis=-1, keepdims=True)
    return (x - mu) * jax.lax.rsqrt(var + eps) * w + b


# --------------------- fused full-forward kernel ------------------------------
def _fused_forward_kernel(num_heads, batch, seq,
                          src_ref, pe_ref, w_in_ref, b_in_ref,
                          w_qkv_ref, b_qkv_ref, w_o_ref, b_o_ref,
                          ln1w_ref, ln1b_ref, ln2w_ref, ln2b_ref,
                          w_ff1_ref, b_ff1_ref, w_ff2_ref, b_ff2_ref,
                          w_fc1_ref, b_fc1_ref, w_fc2_ref, b_fc2_ref,
                          out_ref, x_state):
    l = pl.program_id(0)
    B, S = batch, seq
    N, D = x_state.shape          # N = B * S
    H = num_heads
    Dh = D // H

    # ---- layer-0 prologue: input projection + positional encoding ----------
    @pl.when(l == 0)
    def _():
        src = jnp.concatenate([src_ref[b] for b in range(B)], axis=0)  # (N, Din)
        x0 = jnp.dot(src.astype(jnp.bfloat16), w_in_ref[...],
                     preferred_element_type=jnp.float32) + b_in_ref[...]
        # PE quirk (faithful to the PyTorch module with batch_first inputs):
        # the PE row is selected by the BATCH index and broadcast over sequence.
        pe = jnp.concatenate(
            [jnp.broadcast_to(pe_ref[b], (S, D)) for b in range(B)], axis=0)
        x_state[...] = x0 + pe
        # TODO(synk): nn.Dropout is treated as identity (inference mode).

    x = x_state[...]                                       # (N, D) f32
    x_bf = x.astype(jnp.bfloat16)

    # ---- multi-head self attention (batch*heads on the leading axis) -------
    qkv = jnp.dot(x_bf, w_qkv_ref[0],
                  preferred_element_type=jnp.float32) + b_qkv_ref[0]   # (N, 3D)
    scale = 1.0 / math.sqrt(Dh)
    q = qkv[:, 0 * D:1 * D] * scale                        # scale folded into q
    k = qkv[:, 1 * D:2 * D]
    v = qkv[:, 2 * D:3 * D]

    def heads(t):                                          # (B*H, S, Dh)
        return jnp.stack([t[b * S:(b + 1) * S, h * Dh:(h + 1) * Dh]
                          for b in range(B) for h in range(H)], axis=0)

    qh = heads(q).astype(jnp.bfloat16)
    kh = heads(k).astype(jnp.bfloat16)
    vh = heads(v).astype(jnp.bfloat16)

    s = jnp.einsum('nqd,nkd->nqk', qh, kh,
                   preferred_element_type=jnp.float32)     # (B*H, S, S) f32
    s = s - jnp.max(s, axis=-1, keepdims=True)
    p = jnp.exp(s)
    p = p * pl.reciprocal(jnp.sum(p, axis=-1, keepdims=True), approx=True)
    ctx = jnp.einsum('nqk,nkd->nqd', p.astype(jnp.bfloat16), vh,
                     preferred_element_type=jnp.float32)   # (B*H, S, Dh)

    attn = jnp.concatenate(
        [jnp.concatenate([ctx[b * H + h] for h in range(H)], axis=-1)
         for b in range(B)], axis=0)                       # (N, D)
    attn = jnp.dot(attn.astype(jnp.bfloat16), w_o_ref[0],
                   preferred_element_type=jnp.float32) + b_o_ref[0]

    y = _layer_norm(x + attn, ln1w_ref[0], ln1b_ref[0])

    # ---- feed forward (ReLU) ------------------------------------------------
    ff = jnp.dot(y.astype(jnp.bfloat16), w_ff1_ref[0],
                 preferred_element_type=jnp.float32) + b_ff1_ref[0]
    ff = jnp.maximum(ff, 0.0)
    ff = jnp.dot(ff.astype(jnp.bfloat16), w_ff2_ref[0],
                 preferred_element_type=jnp.float32) + b_ff2_ref[0]

    y = _layer_norm(y + ff, ln2w_ref[0], ln2b_ref[0])
    x_state[...] = y                                       # carry to next layer

    # ---- last-layer epilogue: fc1 -> relu -> fc2 on the last token ----------
    @pl.when(l == pl.num_programs(0) - 1)
    def _():
        last = jnp.concatenate(
            [y[b * S + S - 1: b * S + S, :] for b in range(B)], axis=0)   # (B, D)
        h1 = jnp.dot(last.astype(jnp.bfloat16), w_fc1_ref[...],
                     preferred_element_type=jnp.float32) + b_fc1_ref[...]
        h1 = jnp.maximum(h1, 0.0)
        out_ref[...] = jnp.dot(h1.astype(jnp.bfloat16), w_fc2_ref[...],
                               preferred_element_type=jnp.float32) + b_fc2_ref[...]


# ---------------------------- wrapper / glue ----------------------------------
def transformer_forward(params, src, num_heads):
    B, S, Din = src.shape
    D = params['w_in'].shape[1]
    L = params['w_qkv'].shape[0]
    F = params['w_ff1'].shape[2]
    HID = params['w_fc1'].shape[1]
    out_dim = params['w_fc2'].shape[1]
    assert D % num_heads == 0

    kernel = functools.partial(_fused_forward_kernel, num_heads, B, S)

    in_specs = [
        pl.BlockSpec((B, S, Din), lambda l: (0, 0, 0)),          # src (resident)
        pl.BlockSpec((B, 1, D), lambda l: (0, 0, 0)),            # pe (batch rows)
        pl.BlockSpec((Din, D), lambda l: (0, 0)),                # w_in
        pl.BlockSpec((1, D), lambda l: (0, 0)),                  # b_in
        pl.BlockSpec((1, D, 3 * D), lambda l: (l, 0, 0)),        # w_qkv
        pl.BlockSpec((1, 1, 3 * D), lambda l: (l, 0, 0)),        # b_qkv
        pl.BlockSpec((1, D, D), lambda l: (l, 0, 0)),            # w_o
        pl.BlockSpec((1, 1, D), lambda l: (l, 0, 0)),            # b_o
        pl.BlockSpec((1, 1, D), lambda l: (l, 0, 0)),            # ln1_w
        pl.BlockSpec((1, 1, D), lambda l: (l, 0, 0)),            # ln1_b
        pl.BlockSpec((1, 1, D), lambda l: (l, 0, 0)),            # ln2_w
        pl.BlockSpec((1, 1, D), lambda l: (l, 0, 0)),            # ln2_b
        pl.BlockSpec((1, D, F), lambda l: (l, 0, 0)),            # w_ff1
        pl.BlockSpec((1, 1, F), lambda l: (l, 0, 0)),            # b_ff1
        pl.BlockSpec((1, F, D), lambda l: (l, 0, 0)),            # w_ff2
        pl.BlockSpec((1, 1, D), lambda l: (l, 0, 0)),            # b_ff2
        pl.BlockSpec((D, HID), lambda l: (0, 0)),                # w_fc1
        pl.BlockSpec((1, HID), lambda l: (0, 0)),                # b_fc1
        pl.BlockSpec((HID, out_dim), lambda l: (0, 0)),          # w_fc2
        pl.BlockSpec((1, out_dim), lambda l: (0, 0)),            # b_fc2
    ]

    out = pl.pallas_call(
        kernel,
        grid=(L,),
        in_specs=in_specs,
        out_specs=pl.BlockSpec((B, out_dim), lambda l: (0, 0)),
        out_shape=jax.ShapeDtypeStruct((B, out_dim), jnp.float32),
        scratch_shapes=[pltpu.VMEM((B * S, D), jnp.float32)],    # resident acts
        compiler_params=pltpu.CompilerParams(
            dimension_semantics=("arbitrary",),
            vmem_limit_bytes=64 * 1024 * 1024),
    )(src, params['pe'], params['w_in'], params['b_in'],
      params['w_qkv'], params['b_qkv'], params['w_o'], params['b_o'],
      params['ln1_w'], params['ln1_b'], params['ln2_w'], params['ln2_b'],
      params['w_ff1'], params['b_ff1'], params['w_ff2'], params['b_ff2'],
      params['w_fc1'], params['b_fc1'], params['w_fc2'], params['b_fc2'])
    return out


def _make_pe(n_rows, d):
    pos = jnp.arange(n_rows, dtype=jnp.float32)[:, None]
    div = jnp.exp(jnp.arange(0, d, 2, dtype=jnp.float32) * (-math.log(10000.0) / d))
    pe = jnp.zeros((n_rows, d), jnp.float32)
    pe = pe.at[:, 0::2].set(jnp.sin(pos * div))
    pe = pe.at[:, 1::2].set(jnp.cos(pos * div))
    return pe.reshape(n_rows, 1, d)


def init_params(key, input_dim, model_dim, num_layers, output_dim, batch,
                dim_feedforward=2048):
    D = model_dim
    ks = jax.random.split(key, 3 + num_layers)
    bf16 = jnp.bfloat16   # weights stored bf16 (halved DMA); f32 accumulation

    def lin(k, fin, fout):
        w = jax.random.normal(k, (fin, fout), jnp.float32) * (1.0 / math.sqrt(fin))
        b = jnp.zeros((1, fout), jnp.float32)
        return w, b

    w_in, b_in = lin(ks[0], input_dim, D)
    w_fc1, b_fc1 = lin(ks[1], D, 128)
    w_fc2, b_fc2 = lin(ks[2], 128, output_dim)

    w_qkv, b_qkv, w_o, b_o = [], [], [], []
    w_ff1, b_ff1, w_ff2, b_ff2 = [], [], [], []
    for i in range(num_layers):
        lk = jax.random.split(ks[3 + i], 4)
        wq, bq = lin(lk[0], D, 3 * D)
        wo_, bo_ = lin(lk[1], D, D)
        w1, b1 = lin(lk[2], D, dim_feedforward)
        w2, b2 = lin(lk[3], dim_feedforward, D)
        w_qkv.append(wq); b_qkv.append(bq)
        w_o.append(wo_); b_o.append(bo_)
        w_ff1.append(w1); b_ff1.append(b1)
        w_ff2.append(w2); b_ff2.append(b2)

    L = num_layers
    params = dict(
        w_in=w_in.astype(bf16), b_in=b_in,
        pe=_make_pe(batch, D),                       # only rows [0, batch) used
        w_qkv=jnp.stack(w_qkv).astype(bf16), b_qkv=jnp.stack(b_qkv),
        w_o=jnp.stack(w_o).astype(bf16), b_o=jnp.stack(b_o),
        ln1_w=jnp.ones((L, 1, D), jnp.float32), ln1_b=jnp.zeros((L, 1, D), jnp.float32),
        ln2_w=jnp.ones((L, 1, D), jnp.float32), ln2_b=jnp.zeros((L, 1, D), jnp.float32),
        w_ff1=jnp.stack(w_ff1).astype(bf16), b_ff1=jnp.stack(b_ff1),
        w_ff2=jnp.stack(w_ff2).astype(bf16), b_ff2=jnp.stack(b_ff2),
        w_fc1=w_fc1.astype(bf16), b_fc1=b_fc1,
        w_fc2=w_fc2.astype(bf16), b_fc2=b_fc2,
    )
    return params


if __name__ == "__main__":
    B, S = 2, 8
    input_dim, model_dim, num_heads, num_layers, output_dim = 16, 32, 4, 2, 8

    key = jax.random.PRNGKey(0)
    kp, kx = jax.random.split(key)
    params = init_params(kp, input_dim, model_dim, num_layers, output_dim, batch=B)
    src = jax.random.normal(kx, (B, S, input_dim), jnp.float32)

    out = transformer_forward(params, src, num_heads)
    out = jax.block_until_ready(out)

    assert out.shape == (B, output_dim), out.shape
    assert bool(jnp.all(jnp.isfinite(out)))
    print("KERNEL_OK")
</pallas_src>

<mosaic_0001>
module attributes {stable_mosaic.version = 11 : i64} {
  func.func @_fused_forward_kernel(%arg0: i32, %arg1: memref<2x8x16xf32, #tpu.memory_space<vmem>>, %arg2: memref<2x1x32xf32, #tpu.memory_space<vmem>>, %arg3: memref<16x32xbf16, #tpu.memory_space<vmem>>, %arg4: memref<1x32xf32, #tpu.memory_space<vmem>>, %arg5: memref<1x32x96xbf16, #tpu.memory_space<vmem>>, %arg6: memref<1x1x96xf32, #tpu.memory_space<vmem>>, %arg7: memref<1x32x32xbf16, #tpu.memory_space<vmem>>, %arg8: memref<1x1x32xf32, #tpu.memory_space<vmem>>, %arg9: memref<1x1x32xf32, #tpu.memory_space<vmem>>, %arg10: memref<1x1x32xf32, #tpu.memory_space<vmem>>, %arg11: memref<1x1x32xf32, #tpu.memory_space<vmem>>, %arg12: memref<1x1x32xf32, #tpu.memory_space<vmem>>, %arg13: memref<1x32x2048xbf16, #tpu.memory_space<vmem>>, %arg14: memref<1x1x2048xf32, #tpu.memory_space<vmem>>, %arg15: memref<1x2048x32xbf16, #tpu.memory_space<vmem>>, %arg16: memref<1x1x32xf32, #tpu.memory_space<vmem>>, %arg17: memref<32x128xbf16, #tpu.memory_space<vmem>>, %arg18: memref<1x128xf32, #tpu.memory_space<vmem>>, %arg19: memref<128x8xbf16, #tpu.memory_space<vmem>>, %arg20: memref<1x8xf32, #tpu.memory_space<vmem>>, %arg21: memref<2x8xf32, #tpu.memory_space<vmem>>, %arg22: memref<16x32xf32, #tpu.memory_space<vmem>>) attributes {dimension_semantics = [#tpu.dimension_semantics<arbitrary>], iteration_bounds = array<i64: 2>, scalar_prefetch = 0 : i64, scratch_operands = 1 : i64, tpu.core_type = #tpu.core_type<tc>, window_params = [{pipeline_mode = #tpu.pipeline_mode<synchronous>, transform_indices = @transform_0, window_bounds = array<i64: 2, 8, 16>}, {pipeline_mode = #tpu.pipeline_mode<synchronous>, transform_indices = @transform_1, window_bounds = array<i64: 2, 1, 32>}, {pipeline_mode = #tpu.pipeline_mode<synchronous>, transform_indices = @transform_2, window_bounds = array<i64: 16, 32>}, {pipeline_mode = #tpu.pipeline_mode<synchronous>, transform_indices = @transform_3, window_bounds = array<i64: 1, 32>}, {transform_indices = @transform_4, window_bounds = array<i64: 1, 32, 96>}, {transform_indices = @transform_5, window_bounds = array<i64: 1, 1, 96>}, {transform_indices = @transform_6, window_bounds = array<i64: 1, 32, 32>}, {transform_indices = @transform_7, window_bounds = array<i64: 1, 1, 32>}, {transform_indices = @transform_8, window_bounds = array<i64: 1, 1, 32>}, {transform_indices = @transform_9, window_bounds = array<i64: 1, 1, 32>}, {transform_indices = @transform_10, window_bounds = array<i64: 1, 1, 32>}, {transform_indices = @transform_11, window_bounds = array<i64: 1, 1, 32>}, {transform_indices = @transform_12, window_bounds = array<i64: 1, 32, 2048>}, {transform_indices = @transform_13, window_bounds = array<i64: 1, 1, 2048>}, {transform_indices = @transform_14, window_bounds = array<i64: 1, 2048, 32>}, {transform_indices = @transform_15, window_bounds = array<i64: 1, 1, 32>}, {pipeline_mode = #tpu.pipeline_mode<synchronous>, transform_indices = @transform_16, window_bounds = array<i64: 32, 128>}, {pipeline_mode = #tpu.pipeline_mode<synchronous>, transform_indices = @transform_17, window_bounds = array<i64: 1, 128>}, {pipeline_mode = #tpu.pipeline_mode<synchronous>, transform_indices = @transform_18, window_bounds = array<i64: 128, 8>}, {pipeline_mode = #tpu.pipeline_mode<synchronous>, transform_indices = @transform_19, window_bounds = array<i64: 1, 8>}, {pipeline_mode = #tpu.pipeline_mode<synchronous>, transform_indices = @transform_20, window_bounds = array<i64: 2, 8>}]} {
    %c0_i32 = arith.constant 0 : i32
    %0 = arith.cmpi eq, %arg0, %c0_i32 : i32
    %1 = arith.extui %0 : i1 to i32
    %c0_i32_0 = arith.constant 0 : i32
    %2 = arith.cmpi ne, %1, %c0_i32_0 : i32
    scf.if %2 {
      %c0_60 = arith.constant 0 : index
      %c0_61 = arith.constant 0 : index
      %c0_62 = arith.constant 0 : index
      %187 = vector.load %arg1[%c0_60, %c0_61, %c0_62] : memref<2x8x16xf32, #tpu.memory_space<vmem>>, vector<1x8x16xf32>
      %188 = vector.shape_cast %187 : vector<1x8x16xf32> to vector<8x16xf32>
      %c1 = arith.constant 1 : index
      %c0_63 = arith.constant 0 : index
      %c0_64 = arith.constant 0 : index
      %189 = vector.load %arg1[%c1, %c0_63, %c0_64] : memref<2x8x16xf32, #tpu.memory_space<vmem>>, vector<1x8x16xf32>
      %190 = vector.shape_cast %189 : vector<1x8x16xf32> to vector<8x16xf32>
      %191 = tpu.concatenate %188, %190 in 0 : vector<8x16xf32>, vector<8x16xf32> -> vector<16x16xf32>
      %192 = arith.truncf %191 : vector<16x16xf32> to vector<16x16xbf16>
      %c0_65 = arith.constant 0 : index
      %c0_66 = arith.constant 0 : index
      %193 = vector.load %arg3[%c0_65, %c0_66] : memref<16x32xbf16, #tpu.memory_space<vmem>>, vector<16x32xbf16>
      %cst_67 = arith.constant dense<0.000000e+00> : vector<16x32xf32>
      %194 = tpu.matmul %192, %193, %cst_67 {dimension_numbers = #tpu.dot_dimension_numbers<[1], [0], [0], [1], [0, 0, 1, 1], [], []>} : vector<16x16xbf16>, vector<16x32xbf16>, vector<16x32xf32> -> vector<16x32xf32>
      %c0_68 = arith.constant 0 : index
      %c0_69 = arith.constant 0 : index
      %195 = vector.load %arg4[%c0_68, %c0_69] : memref<1x32xf32, #tpu.memory_space<vmem>>, vector<1x32xf32>
      %196 = vector.broadcast %195 : vector<1x32xf32> to vector<16x32xf32>
      %197 = arith.addf %194, %196 : vector<16x32xf32>
      %c0_70 = arith.constant 0 : index
      %c0_71 = arith.constant 0 : index
      %c0_72 = arith.constant 0 : index
      %198 = vector.load %arg2[%c0_70, %c0_71, %c0_72] : memref<2x1x32xf32, #tpu.memory_space<vmem>>, vector<1x1x32xf32>
      %199 = vector.shape_cast %198 : vector<1x1x32xf32> to vector<1x32xf32>
      %200 = vector.shape_cast %199 : vector<1x32xf32> to vector<1x32xf32>
      %201 = vector.broadcast %200 : vector<1x32xf32> to vector<8x32xf32>
      %c1_73 = arith.constant 1 : index
      %c0_74 = arith.constant 0 : index
      %c0_75 = arith.constant 0 : index
      %202 = vector.load %arg2[%c1_73, %c0_74, %c0_75] : memref<2x1x32xf32, #tpu.memory_space<vmem>>, vector<1x1x32xf32>
      %203 = vector.shape_cast %202 : vector<1x1x32xf32> to vector<1x32xf32>
      %204 = vector.shape_cast %203 : vector<1x32xf32> to vector<1x32xf32>
      %205 = vector.broadcast %204 : vector<1x32xf32> to vector<8x32xf32>
      %206 = tpu.concatenate %201, %205 in 0 : vector<8x32xf32>, vector<8x32xf32> -> vector<16x32xf32>
      %207 = arith.addf %197, %206 : vector<16x32xf32>
      %c0_76 = arith.constant 0 : index
      %c0_77 = arith.constant 0 : index
      %208 = vector.load %arg22[%c0_76, %c0_77] : memref<16x32xf32, #tpu.memory_space<vmem>>, vector<16x32xf32>
      tpu.vector_store %arg22[%c0_76, %c0_77], %207 {strides = array<i32>} : memref<16x32xf32, #tpu.memory_space<vmem>>, vector<16x32xf32>,
    } else {
    }
    %c0 = arith.constant 0 : index
    %c0_1 = arith.constant 0 : index
    %3 = vector.load %arg22[%c0, %c0_1] : memref<16x32xf32, #tpu.memory_space<vmem>>, vector<16x32xf32>
    %4 = arith.truncf %3 : vector<16x32xf32> to vector<16x32xbf16>
    %c0_2 = arith.constant 0 : index
    %c0_3 = arith.constant 0 : index
    %c0_4 = arith.constant 0 : index
    %5 = vector.load %arg5[%c0_2, %c0_3, %c0_4] : memref<1x32x96xbf16, #tpu.memory_space<vmem>>, vector<1x32x96xbf16>
    %6 = vector.shape_cast %5 : vector<1x32x96xbf16> to vector<32x96xbf16>
    %cst = arith.constant dense<0.000000e+00> : vector<16x96xf32>
    %7 = tpu.matmul %4, %6, %cst {dimension_numbers = #tpu.dot_dimension_numbers<[1], [0], [0], [1], [0, 0, 1, 1], [], []>} : vector<16x32xbf16>, vector<32x96xbf16>, vector<16x96xf32> -> vector<16x96xf32>
    %c0_5 = arith.constant 0 : index
    %c0_6 = arith.constant 0 : index
    %c0_7 = arith.constant 0 : index
    %8 = vector.load %arg6[%c0_5, %c0_6, %c0_7] : memref<1x1x96xf32, #tpu.memory_space<vmem>>, vector<1x1x96xf32>
    %9 = vector.shape_cast %8 : vector<1x1x96xf32> to vector<1x96xf32>
    %10 = vector.broadcast %9 : vector<1x96xf32> to vector<16x96xf32>
    %11 = arith.addf %7, %10 : vector<16x96xf32>
    %12 = vector.extract_strided_slice %11 {offsets = [0, 0], sizes = [16, 32], strides = [1, 1]} : vector<16x96xf32> to vector<16x32xf32>
    %cst_8 = arith.constant 0.353553385 : f32
    %13 = vector.broadcast %cst_8 : f32 to vector<16x32xf32>
    %14 = arith.mulf %12, %13 : vector<16x32xf32>
    %15 = vector.extract_strided_slice %11 {offsets = [0, 32], sizes = [16, 32], strides = [1, 1]} : vector<16x96xf32> to vector<16x32xf32>
    %16 = vector.extract_strided_slice %11 {offsets = [0, 64], sizes = [16, 32], strides = [1, 1]} : vector<16x96xf32> to vector<16x32xf32>
    %17 = vector.extract_strided_slice %14 {offsets = [0, 0], sizes = [8, 8], strides = [1, 1]} : vector<16x32xf32> to vector<8x8xf32>
    %18 = vector.extract_strided_slice %14 {offsets = [0, 8], sizes = [8, 8], strides = [1, 1]} : vector<16x32xf32> to vector<8x8xf32>
    %19 = vector.extract_strided_slice %14 {offsets = [0, 16], sizes = [8, 8], strides = [1, 1]} : vector<16x32xf32> to vector<8x8xf32>
    %20 = vector.extract_strided_slice %14 {offsets = [0, 24], sizes = [8, 8], strides = [1, 1]} : vector<16x32xf32> to vector<8x8xf32>
    %21 = vector.extract_strided_slice %14 {offsets = [8, 0], sizes = [8, 8], strides = [1, 1]} : vector<16x32xf32> to vector<8x8xf32>
    %22 = vector.extract_strided_slice %14 {offsets = [8, 8], sizes = [8, 8], strides = [1, 1]} : vector<16x32xf32> to vector<8x8xf32>
    %23 = vector.extract_strided_slice %14 {offsets = [8, 16], sizes = [8, 8], strides = [1, 1]} : vector<16x32xf32> to vector<8x8xf32>
    %24 = vector.extract_strided_slice %14 {offsets = [8, 24], sizes = [8, 8], strides = [1, 1]} : vector<16x32xf32> to vector<8x8xf32>
    %25 = vector.shape_cast %17 : vector<8x8xf32> to vector<1x8x8xf32>
    %26 = vector.shape_cast %18 : vector<8x8xf32> to vector<1x8x8xf32>
    %27 = vector.shape_cast %19 : vector<8x8xf32> to vector<1x8x8xf32>
    %28 = vector.shape_cast %20 : vector<8x8xf32> to vector<1x8x8xf32>
    %29 = vector.shape_cast %21 : vector<8x8xf32> to vector<1x8x8xf32>
    %30 = vector.shape_cast %22 : vector<8x8xf32> to vector<1x8x8xf32>
    %31 = vector.shape_cast %23 : vector<8x8xf32> to vector<1x8x8xf32>
    %32 = vector.shape_cast %24 : vector<8x8xf32> to vector<1x8x8xf32>
    %33 = tpu.concatenate %25, %26, %27, %28, %29, %30, %31, %32 in 0 : vector<1x8x8xf32>, vector<1x8x8xf32>, vector<1x8x8xf32>, vector<1x8x8xf32>, vector<1x8x8xf32>, vector<1x8x8xf32>, vector<1x8x8xf32>, vector<1x8x8xf32> -> vector<8x8x8xf32>
    %34 = arith.truncf %33 : vector<8x8x8xf32> to vector<8x8x8xbf16>
    %35 = vector.extract_strided_slice %15 {offsets = [0, 0], sizes = [8, 8], strides = [1, 1]} : vector<16x32xf32> to vector<8x8xf32>
    %36 = vector.extract_strided_slice %15 {offsets = [0, 8], sizes = [8, 8], strides = [1, 1]} : vector<16x32xf32> to vector<8x8xf32>
    %37 = vector.extract_strided_slice %15 {offsets = [0, 16], sizes = [8, 8], strides = [1, 1]} : vector<16x32xf32> to vector<8x8xf32>
    %38 = vector.extract_strided_slice %15 {offsets = [0, 24], sizes = [8, 8], strides = [1, 1]} : vector<16x32xf32> to vector<8x8xf32>
    %39 = vector.extract_strided_slice %15 {offsets = [8, 0], sizes = [8, 8], strides = [1, 1]} : vector<16x32xf32> to vector<8x8xf32>
    %40 = vector.extract_strided_slice %15 {offsets = [8, 8], sizes = [8, 8], strides = [1, 1]} : vector<16x32xf32> to vector<8x8xf32>
    %41 = vector.extract_strided_slice %15 {offsets = [8, 16], sizes = [8, 8], strides = [1, 1]} : vector<16x32xf32> to vector<8x8xf32>
    %42 = vector.extract_strided_slice %15 {offsets = [8, 24], sizes = [8, 8], strides = [1, 1]} : vector<16x32xf32> to vector<8x8xf32>
    %43 = vector.shape_cast %35 : vector<8x8xf32> to vector<1x8x8xf32>
    %44 = vector.shape_cast %36 : vector<8x8xf32> to vector<1x8x8xf32>
    %45 = vector.shape_cast %37 : vector<8x8xf32> to vector<1x8x8xf32>
    %46 = vector.shape_cast %38 : vector<8x8xf32> to vector<1x8x8xf32>
    %47 = vector.shape_cast %39 : vector<8x8xf32> to vector<1x8x8xf32>
    %48 = vector.shape_cast %40 : vector<8x8xf32> to vector<1x8x8xf32>
    %49 = vector.shape_cast %41 : vector<8x8xf32> to vector<1x8x8xf32>
    %50 = vector.shape_cast %42 : vector<8x8xf32> to vector<1x8x8xf32>
    %51 = tpu.concatenate %43, %44, %45, %46, %47, %48, %49, %50 in 0 : vector<1x8x8xf32>, vector<1x8x8xf32>, vector<1x8x8xf32>, vector<1x8x8xf32>, vector<1x8x8xf32>, vector<1x8x8xf32>, vector<1x8x8xf32>, vector<1x8x8xf32> -> vector<8x8x8xf32>
    %52 = arith.truncf %51 : vector<8x8x8xf32> to vector<8x8x8xbf16>
    %53 = vector.extract_strided_slice %16 {offsets = [0, 0], sizes = [8, 8], strides = [1, 1]} : vector<16x32xf32> to vector<8x8xf32>
    %54 = vector.extract_strided_slice %16 {offsets = [0, 8], sizes = [8, 8], strides = [1, 1]} : vector<16x32xf32> to vector<8x8xf32>
    %55 = vector.extract_strided_slice %16 {offsets = [0, 16], sizes = [8, 8], strides = [1, 1]} : vector<16x32xf32> to vector<8x8xf32>
    %56 = vector.extract_strided_slice %16 {offsets = [0, 24], sizes = [8, 8], strides = [1, 1]} : vector<16x32xf32> to vector<8x8xf32>
    %57 = vector.extract_strided_slice %16 {offsets = [8, 0], sizes = [8, 8], strides = [1, 1]} : vector<16x32xf32> to vector<8x8xf32>
    %58 = vector.extract_strided_slice %16 {offsets = [8, 8], sizes = [8, 8], strides = [1, 1]} : vector<16x32xf32> to vector<8x8xf32>
    %59 = vector.extract_strided_slice %16 {offsets = [8, 16], sizes = [8, 8], strides = [1, 1]} : vector<16x32xf32> to vector<8x8xf32>
    %60 = vector.extract_strided_slice %16 {offsets = [8, 24], sizes = [8, 8], strides = [1, 1]} : vector<16x32xf32> to vector<8x8xf32>
    %61 = vector.shape_cast %53 : vector<8x8xf32> to vector<1x8x8xf32>
    %62 = vector.shape_cast %54 : vector<8x8xf32> to vector<1x8x8xf32>
    %63 = vector.shape_cast %55 : vector<8x8xf32> to vector<1x8x8xf32>
    %64 = vector.shape_cast %56 : vector<8x8xf32> to vector<1x8x8xf32>
    %65 = vector.shape_cast %57 : vector<8x8xf32> to vector<1x8x8xf32>
    %66 = vector.shape_cast %58 : vector<8x8xf32> to vector<1x8x8xf32>
    %67 = vector.shape_cast %59 : vector<8x8xf32> to vector<1x8x8xf32>
    %68 = vector.shape_cast %60 : vector<8x8xf32> to vector<1x8x8xf32>
    %69 = tpu.concatenate %61, %62, %63, %64, %65, %66, %67, %68 in 0 : vector<1x8x8xf32>, vector<1x8x8xf32>, vector<1x8x8xf32>, vector<1x8x8xf32>, vector<1x8x8xf32>, vector<1x8x8xf32>, vector<1x8x8xf32>, vector<1x8x8xf32> -> vector<8x8x8xf32>
    %70 = arith.truncf %69 : vector<8x8x8xf32> to vector<8x8x8xbf16>
    "tpu.trace_start"() <{level = 10 : i32, message = "nqd,nkd->nqk"}> : () -> ()
    %cst_9 = arith.constant dense<0.000000e+00> : vector<8x8x8xf32>
    %71 = tpu.matmul %34, %52, %cst_9 {dimension_numbers = #tpu.dot_dimension_numbers<[2], [2], [1], [1], [0, 0, 0, 1, 1, 1], [0], [0]>} : vector<8x8x8xbf16>, vector<8x8x8xbf16>, vector<8x8x8xf32> -> vector<8x8x8xf32>
    "tpu.trace_stop"() : () -> ()
    %cst_10 = arith.constant dense<0xFF800000> : vector<8x8xf32>
    %72 = vector.multi_reduction <maximumf>, %71, %cst_10 [2] : vector<8x8x8xf32> to vector<8x8xf32>
    %73 = vector.shape_cast %72 : vector<8x8xf32> to vector<8x8x1xf32>
    %74 = vector.broadcast %73 : vector<8x8x1xf32> to vector<8x8x8xf32>
    %75 = arith.subf %71, %74 : vector<8x8x8xf32>
    %76 = math.exp %75 : vector<8x8x8xf32>
    %cst_11 = arith.constant dense<0.000000e+00> : vector<8x8xf32>
    %77 = vector.multi_reduction <add>, %76, %cst_11 [2] : vector<8x8x8xf32> to vector<8x8xf32>
    %78 = vector.shape_cast %77 : vector<8x8xf32> to vector<8x8x1xf32>
    %79 = tpu.reciprocal %78 {approx = true} : vector<8x8x1xf32> -> vector<8x8x1xf32>
    %80 = vector.broadcast %79 : vector<8x8x1xf32> to vector<8x8x8xf32>
    %81 = arith.mulf %76, %80 : vector<8x8x8xf32>
    %82 = arith.truncf %81 : vector<8x8x8xf32> to vector<8x8x8xbf16>
    "tpu.trace_start"() <{level = 10 : i32, message = "nqk,nkd->nqd"}> : () -> ()
    %cst_12 = arith.constant dense<0.000000e+00> : vector<8x8x8xf32>
    %83 = tpu.matmul %82, %70, %cst_12 {dimension_numbers = #tpu.dot_dimension_numbers<[2], [1], [1], [2], [0, 0, 0, 1, 1, 2], [0], [0]>} : vector<8x8x8xbf16>, vector<8x8x8xbf16>, vector<8x8x8xf32> -> vector<8x8x8xf32>
    "tpu.trace_stop"() : () -> ()
    %84 = vector.extract_strided_slice %83 {offsets = [0, 0, 0], sizes = [1, 8, 8], strides = [1, 1, 1]} : vector<8x8x8xf32> to vector<1x8x8xf32>
    %85 = vector.shape_cast %84 : vector<1x8x8xf32> to vector<8x8xf32>
    %86 = vector.extract_strided_slice %83 {offsets = [1, 0, 0], sizes = [1, 8, 8], strides = [1, 1, 1]} : vector<8x8x8xf32> to vector<1x8x8xf32>
    %87 = vector.shape_cast %86 : vector<1x8x8xf32> to vector<8x8xf32>
    %88 = vector.extract_strided_slice %83 {offsets = [2, 0, 0], sizes = [1, 8, 8], strides = [1, 1, 1]} : vector<8x8x8xf32> to vector<1x8x8xf32>
    %89 = vector.shape_cast %88 : vector<1x8x8xf32> to vector<8x8xf32>
    %90 = vector.extract_strided_slice %83 {offsets = [3, 0, 0], sizes = [1, 8, 8], strides = [1, 1, 1]} : vector<8x8x8xf32> to vector<1x8x8xf32>
    %91 = vector.shape_cast %90 : vector<1x8x8xf32> to vector<8x8xf32>
    %92 = tpu.concatenate %85, %87, %89, %91 in 1 : vector<8x8xf32>, vector<8x8xf32>, vector<8x8xf32>, vector<8x8xf32> -> vector<8x32xf32>
    %93 = vector.extract_strided_slice %83 {offsets = [4, 0, 0], sizes = [1, 8, 8], strides = [1, 1, 1]} : vector<8x8x8xf32> to vector<1x8x8xf32>
    %94 = vector.shape_cast %93 : vector<1x8x8xf32> to vector<8x8xf32>
    %95 = vector.extract_strided_slice %83 {offsets = [5, 0, 0], sizes = [1, 8, 8], strides = [1, 1, 1]} : vector<8x8x8xf32> to vector<1x8x8xf32>
    %96 = vector.shape_cast %95 : vector<1x8x8xf32> to vector<8x8xf32>
    %97 = vector.extract_strided_slice %83 {offsets = [6, 0, 0], sizes = [1, 8, 8], strides = [1, 1, 1]} : vector<8x8x8xf32> to vector<1x8x8xf32>
    %98 = vector.shape_cast %97 : vector<1x8x8xf32> to vector<8x8xf32>
    %99 = vector.extract_strided_slice %83 {offsets = [7, 0, 0], sizes = [1, 8, 8], strides = [1, 1, 1]} : vector<8x8x8xf32> to vector<1x8x8xf32>
    %100 = vector.shape_cast %99 : vector<1x8x8xf32> to vector<8x8xf32>
    %101 = tpu.concatenate %94, %96, %98, %100 in 1 : vector<8x8xf32>, vector<8x8xf32>, vector<8x8xf32>, vector<8x8xf32> -> vector<8x32xf32>
    %102 = tpu.concatenate %92, %101 in 0 : vector<8x32xf32>, vector<8x32xf32> -> vector<16x32xf32>
    %103 = arith.truncf %102 : vector<16x32xf32> to vector<16x32xbf16>
    %c0_13 = arith.constant 0 : index
    %c0_14 = arith.constant 0 : index
    %c0_15 = arith.constant 0 : index
    %104 = vector.load %arg7[%c0_13, %c0_14, %c0_15] : memref<1x32x32xbf16, #tpu.memory_space<vmem>>, vector<1x32x32xbf16>
    %105 = vector.shape_cast %104 : vector<1x32x32xbf16> to vector<32x32xbf16>
    %cst_16 = arith.constant dense<0.000000e+00> : vector<16x32xf32>
    %106 = tpu.matmul %103, %105, %cst_16 {dimension_numbers = #tpu.dot_dimension_numbers<[1], [0], [0], [1], [0, 0, 1, 1], [], []>} : vector<16x32xbf16>, vector<32x32xbf16>, vector<16x32xf32> -> vector<16x32xf32>
    %c0_17 = arith.constant 0 : index
    %c0_18 = arith.constant 0 : index
    %c0_19 = arith.constant 0 : index
    %107 = vector.load %arg8[%c0_17, %c0_18, %c0_19] : memref<1x1x32xf32, #tpu.memory_space<vmem>>, vector<1x1x32xf32>
    %108 = vector.shape_cast %107 : vector<1x1x32xf32> to vector<1x32xf32>
    %109 = vector.broadcast %108 : vector<1x32xf32> to vector<16x32xf32>
    %110 = arith.addf %106, %109 : vector<16x32xf32>
    %111 = arith.addf %3, %110 : vector<16x32xf32>
    %c0_20 = arith.constant 0 : index
    %c0_21 = arith.constant 0 : index
    %c0_22 = arith.constant 0 : index
    %112 = vector.load %arg9[%c0_20, %c0_21, %c0_22] : memref<1x1x32xf32, #tpu.memory_space<vmem>>, vector<1x1x32xf32>
    %113 = vector.shape_cast %112 : vector<1x1x32xf32> to vector<1x32xf32>
    %c0_23 = arith.constant 0 : index
    %c0_24 = arith.constant 0 : index
    %c0_25 = arith.constant 0 : index
    %114 = vector.load %arg10[%c0_23, %c0_24, %c0_25] : memref<1x1x32xf32, #tpu.memory_space<vmem>>, vector<1x1x32xf32>
    %115 = vector.shape_cast %114 : vector<1x1x32xf32> to vector<1x32xf32>
    %cst_26 = arith.constant dense<0.000000e+00> : vector<16xf32>
    %116 = vector.multi_reduction <add>, %111, %cst_26 [1] : vector<16x32xf32> to vector<16xf32>
    %117 = vector.shape_cast %116 : vector<16xf32> to vector<16x1xf32>
    %cst_27 = arith.constant 3.200000e+01 : f32
    %118 = vector.broadcast %cst_27 : f32 to vector<16x1xf32>
    %119 = arith.divf %117, %118 : vector<16x1xf32>
    %120 = vector.broadcast %119 : vector<16x1xf32> to vector<16x32xf32>
    %121 = arith.subf %111, %120 : vector<16x32xf32>
    %122 = arith.mulf %121, %121 : vector<16x32xf32>
    %cst_28 = arith.constant dense<0.000000e+00> : vector<16xf32>
    %123 = vector.multi_reduction <add>, %122, %cst_28 [1] : vector<16x32xf32> to vector<16xf32>
    %124 = vector.shape_cast %123 : vector<16xf32> to vector<16x1xf32>
    %cst_29 = arith.constant 3.200000e+01 : f32
    %125 = vector.broadcast %cst_29 : f32 to vector<16x1xf32>
    %126 = arith.divf %124, %125 : vector<16x1xf32>
    %127 = vector.broadcast %119 : vector<16x1xf32> to vector<16x32xf32>
    %128 = arith.subf %111, %127 : vector<16x32xf32>
    %cst_30 = arith.constant 9.99999974E-6 : f32
    %129 = vector.broadcast %cst_30 : f32 to vector<16x1xf32>
    %130 = arith.addf %126, %129 : vector<16x1xf32>
    %131 = math.rsqrt %130 : vector<16x1xf32>
    %132 = vector.broadcast %131 : vector<16x1xf32> to vector<16x32xf32>
    %133 = arith.mulf %128, %132 : vector<16x32xf32>
    %134 = vector.broadcast %113 : vector<1x32xf32> to vector<16x32xf32>
    %135 = arith.mulf %133, %134 : vector<16x32xf32>
    %136 = vector.broadcast %115 : vector<1x32xf32> to vector<16x32xf32>
    %137 = arith.addf %135, %136 : vector<16x32xf32>
    %138 = arith.truncf %137 : vector<16x32xf32> to vector<16x32xbf16>
    %c0_31 = arith.constant 0 : index
    %c0_32 = arith.constant 0 : index
    %c0_33 = arith.constant 0 : index
    %139 = vector.load %arg13[%c0_31, %c0_32, %c0_33] : memref<1x32x2048xbf16, #tpu.memory_space<vmem>>, vector<1x32x2048xbf16>
    %140 = vector.shape_cast %139 : vector<1x32x2048xbf16> to vector<32x2048xbf16>
    %cst_34 = arith.constant dense<0.000000e+00> : vector<16x2048xf32>
    %141 = tpu.matmul %138, %140, %cst_34 {dimension_numbers = #tpu.dot_dimension_numbers<[1], [0], [0], [1], [0, 0, 1, 1], [], []>} : vector<16x32xbf16>, vector<32x2048xbf16>, vector<16x2048xf32> -> vector<16x2048xf32>
    %c0_35 = arith.constant 0 : index
    %c0_36 = arith.constant 0 : index
    %c0_37 = arith.constant 0 : index
    %142 = vector.load %arg14[%c0_35, %c0_36, %c0_37] : memref<1x1x2048xf32, #tpu.memory_space<vmem>>, vector<1x1x2048xf32>
    %143 = vector.shape_cast %142 : vector<1x1x2048xf32> to vector<1x2048xf32>
    %144 = vector.broadcast %143 : vector<1x2048xf32> to vector<16x2048xf32>
    %145 = arith.addf %141, %144 : vector<16x2048xf32>
    %cst_38 = arith.constant 0.000000e+00 : f32
    %146 = vector.broadcast %cst_38 : f32 to vector<16x2048xf32>
    %147 = arith.maximumf %145, %146 : vector<16x2048xf32>
    %148 = arith.truncf %147 : vector<16x2048xf32> to vector<16x2048xbf16>
    %c0_39 = arith.constant 0 : index
    %c0_40 = arith.constant 0 : index
    %c0_41 = arith.constant 0 : index
    %149 = vector.load %arg15[%c0_39, %c0_40, %c0_41] : memref<1x2048x32xbf16, #tpu.memory_space<vmem>>, vector<1x2048x32xbf16>
    %150 = vector.shape_cast %149 : vector<1x2048x32xbf16> to vector<2048x32xbf16>
    %cst_42 = arith.constant dense<0.000000e+00> : vector<16x32xf32>
    %151 = tpu.matmul %148, %150, %cst_42 {dimension_numbers = #tpu.dot_dimension_numbers<[1], [0], [0], [1], [0, 0, 1, 1], [], []>} : vector<16x2048xbf16>, vector<2048x32xbf16>, vector<16x32xf32> -> vector<16x32xf32>
    %c0_43 = arith.constant 0 : index
    %c0_44 = arith.constant 0 : index
    %c0_45 = arith.constant 0 : index
    %152 = vector.load %arg16[%c0_43, %c0_44, %c0_45] : memref<1x1x32xf32, #tpu.memory_space<vmem>>, vector<1x1x32xf32>
    %153 = vector.shape_cast %152 : vector<1x1x32xf32> to vector<1x32xf32>
    %154 = vector.broadcast %153 : vector<1x32xf32> to vector<16x32xf32>
    %155 = arith.addf %151, %154 : vector<16x32xf32>
    %156 = arith.addf %137, %155 : vector<16x32xf32>
    %c0_46 = arith.constant 0 : index
    %c0_47 = arith.constant 0 : index
    %c0_48 = arith.constant 0 : index
    %157 = vector.load %arg11[%c0_46, %c0_47, %c0_48] : memref<1x1x32xf32, #tpu.memory_space<vmem>>, vector<1x1x32xf32>
    %158 = vector.shape_cast %157 : vector<1x1x32xf32> to vector<1x32xf32>
    %c0_49 = arith.constant 0 : index
    %c0_50 = arith.constant 0 : index
    %c0_51 = arith.constant 0 : index
    %159 = vector.load %arg12[%c0_49, %c0_50, %c0_51] : memref<1x1x32xf32, #tpu.memory_space<vmem>>, vector<1x1x32xf32>
    %160 = vector.shape_cast %159 : vector<1x1x32xf32> to vector<1x32xf32>
    %cst_52 = arith.constant dense<0.000000e+00> : vector<16xf32>
    %161 = vector.multi_reduction <add>, %156, %cst_52 [1] : vector<16x32xf32> to vector<16xf32>
    %162 = vector.shape_cast %161 : vector<16xf32> to vector<16x1xf32>
    %cst_53 = arith.constant 3.200000e+01 : f32
    %163 = vector.broadcast %cst_53 : f32 to vector<16x1xf32>
    %164 = arith.divf %162, %163 : vector<16x1xf32>
    %165 = vector.broadcast %164 : vector<16x1xf32> to vector<16x32xf32>
    %166 = arith.subf %156, %165 : vector<16x32xf32>
    %167 = arith.mulf %166, %166 : vector<16x32xf32>
    %cst_54 = arith.constant dense<0.000000e+00> : vector<16xf32>
    %168 = vector.multi_reduction <add>, %167, %cst_54 [1] : vector<16x32xf32> to vector<16xf32>
    %169 = vector.shape_cast %168 : vector<16xf32> to vector<16x1xf32>
    %cst_55 = arith.constant 3.200000e+01 : f32
    %170 = vector.broadcast %cst_55 : f32 to vector<16x1xf32>
    %171 = arith.divf %169, %170 : vector<16x1xf32>
    %172 = vector.broadcast %164 : vector<16x1xf32> to vector<16x32xf32>
    %173 = arith.subf %156, %172 : vector<16x32xf32>
    %cst_56 = arith.constant 9.99999974E-6 : f32
    %174 = vector.broadcast %cst_56 : f32 to vector<16x1xf32>
    %175 = arith.addf %171, %174 : vector<16x1xf32>
    %176 = math.rsqrt %175 : vector<16x1xf32>
    %177 = vector.broadcast %176 : vector<16x1xf32> to vector<16x32xf32>
    %178 = arith.mulf %173, %177 : vector<16x32xf32>
    %179 = vector.broadcast %158 : vector<1x32xf32> to vector<16x32xf32>
    %180 = arith.mulf %178, %179 : vector<16x32xf32>
    %181 = vector.broadcast %160 : vector<1x32xf32> to vector<16x32xf32>
    %182 = arith.addf %180, %181 : vector<16x32xf32>
    %c0_57 = arith.constant 0 : index
    %c0_58 = arith.constant 0 : index
    %183 = vector.load %arg22[%c0_57, %c0_58] : memref<16x32xf32, #tpu.memory_space<vmem>>, vector<16x32xf32>
    tpu.vector_store %arg22[%c0_57, %c0_58], %182 {strides = array<i32>} : memref<16x32xf32, #tpu.memory_space<vmem>>, vector<16x32xf32>,
    %c1_i32 = arith.constant 1 : i32
    %184 = arith.cmpi eq, %arg0, %c1_i32 : i32
    %185 = arith.extui %184 : i1 to i32
    %c0_i32_59 = arith.constant 0 : i32
    %186 = arith.cmpi ne, %185, %c0_i32_59 : i32
    scf.if %186 {
      %187 = vector.extract_strided_slice %182 {offsets = [7, 0], sizes = [1, 32], strides = [1, 1]} : vector<16x32xf32> to vector<1x32xf32>
      %188 = vector.extract_strided_slice %182 {offsets = [15, 0], sizes = [1, 32], strides = [1, 1]} : vector<16x32xf32> to vector<1x32xf32>
      %189 = tpu.concatenate %187, %188 in 0 : vector<1x32xf32>, vector<1x32xf32> -> vector<2x32xf32>
      %190 = arith.truncf %189 : vector<2x32xf32> to vector<2x32xbf16>
      %c0_60 = arith.constant 0 : index
      %c0_61 = arith.constant 0 : index
      %191 = vector.load %arg17[%c0_60, %c0_61] : memref<32x128xbf16, #tpu.memory_space<vmem>>, vector<32x128xbf16>
      %cst_62 = arith.constant dense<0.000000e+00> : vector<2x128xf32>
      %192 = tpu.matmul %190, %191, %cst_62 {dimension_numbers = #tpu.dot_dimension_numbers<[1], [0], [0], [1], [0, 0, 1, 1], [], []>} : vector<2x32xbf16>, vector<32x128xbf16>, vector<2x128xf32> -> vector<2x128xf32>
      %c0_63 = arith.constant 0 : index
      %c0_64 = arith.constant 0 : index
      %193 = vector.load %arg18[%c0_63, %c0_64] : memref<1x128xf32, #tpu.memory_space<vmem>>, vector<1x128xf32>
      %194 = vector.broadcast %193 : vector<1x128xf32> to vector<2x128xf32>
      %195 = arith.addf %192, %194 : vector<2x128xf32>
      %cst_65 = arith.constant 0.000000e+00 : f32
      %196 = vector.broadcast %cst_65 : f32 to vector<2x128xf32>
      %197 = arith.maximumf %195, %196 : vector<2x128xf32>
      %198 = arith.truncf %197 : vector<2x128xf32> to vector<2x128xbf16>
      %c0_66 = arith.constant 0 : index
      %c0_67 = arith.constant 0 : index
      %199 = vector.load %arg19[%c0_66, %c0_67] : memref<128x8xbf16, #tpu.memory_space<vmem>>, vector<128x8xbf16>
      %cst_68 = arith.constant dense<0.000000e+00> : vector<2x8xf32>
      %200 = tpu.matmul %198, %199, %cst_68 {dimension_numbers = #tpu.dot_dimension_numbers<[1], [0], [0], [1], [0, 0, 1, 1], [], []>} : vector<2x128xbf16>, vector<128x8xbf16>, vector<2x8xf32> -> vector<2x8xf32>
      %c0_69 = arith.constant 0 : index
      %c0_70 = arith.constant 0 : index
      %201 = vector.load %arg20[%c0_69, %c0_70] : memref<1x8xf32, #tpu.memory_space<vmem>>, vector<1x8xf32>
      %202 = vector.broadcast %201 : vector<1x8xf32> to vector<2x8xf32>
      %203 = arith.addf %200, %202 : vector<2x8xf32>
      %c0_71 = arith.constant 0 : index
      %c0_72 = arith.constant 0 : index
      %204 = vector.load %arg21[%c0_71, %c0_72] : memref<2x8xf32, #tpu.memory_space<vmem>>, vector<2x8xf32>
      tpu.vector_store %arg21[%c0_71, %c0_72], %203 {strides = array<i32>} : memref<2x8xf32, #tpu.memory_space<vmem>>, vector<2x8xf32>,
    } else {
    }
    return
  }
  func.func @transform_0(%arg0: i32) -> (i32, i32, i32) {
    %c0_i32 = arith.constant 0 : i32
    %c0_i32_0 = arith.constant 0 : i32
    %c0_i32_1 = arith.constant 0 : i32
    %c0_i32_2 = arith.constant 0 : i32
    return %c0_i32, %c0_i32_0, %c0_i32_1 : i32, i32, i32
  }
  func.func @transform_1(%arg0: i32) -> (i32, i32, i32) {
    %c0_i32 = arith.constant 0 : i32
    %c0_i32_0 = arith.constant 0 : i32
    %c0_i32_1 = arith.constant 0 : i32
    %c0_i32_2 = arith.constant 0 : i32
    return %c0_i32, %c0_i32_0, %c0_i32_1 : i32, i32, i32
  }
  func.func @transform_2(%arg0: i32) -> (i32, i32) {
    %c0_i32 = arith.constant 0 : i32
    %c0_i32_0 = arith.constant 0 : i32
    %c0_i32_1 = arith.constant 0 : i32
    return %c0_i32, %c0_i32_0 : i32, i32
  }
  func.func @transform_3(%arg0: i32) -> (i32, i32) {
    %c0_i32 = arith.constant 0 : i32
    %c0_i32_0 = arith.constant 0 : i32
    %c0_i32_1 = arith.constant 0 : i32
    return %c0_i32, %c0_i32_0 : i32, i32
  }
  func.func @transform_4(%arg0: i32) -> (i32, i32, i32) {
    %c0_i32 = arith.constant 0 : i32
    %c0_i32_0 = arith.constant 0 : i32
    %c0_i32_1 = arith.constant 0 : i32
    return %arg0, %c0_i32, %c0_i32_0 : i32, i32, i32
  }
  func.func @transform_5(%arg0: i32) -> (i32, i32, i32) {
    %c0_i32 = arith.constant 0 : i32
    %c0_i32_0 = arith.constant 0 : i32
    %c0_i32_1 = arith.constant 0 : i32
    return %arg0, %c0_i32, %c0_i32_0 : i32, i32, i32
  }
  func.func @transform_6(%arg0: i32) -> (i32, i32, i32) {
    %c0_i32 = arith.constant 0 : i32
    %c0_i32_0 = arith.constant 0 : i32
    %c0_i32_1 = arith.constant 0 : i32
    return %arg0, %c0_i32, %c0_i32_0 : i32, i32, i32
  }
  func.func @transform_7(%arg0: i32) -> (i32, i32, i32) {
    %c0_i32 = arith.constant 0 : i32
    %c0_i32_0 = arith.constant 0 : i32
    %c0_i32_1 = arith.constant 0 : i32
    return %arg0, %c0_i32, %c0_i32_0 : i32, i32, i32
  }
  func.func @transform_8(%arg0: i32) -> (i32, i32, i32) {
    %c0_i32 = arith.constant 0 : i32
    %c0_i32_0 = arith.constant 0 : i32
    %c0_i32_1 = arith.constant 0 : i32
    return %arg0, %c0_i32, %c0_i32_0 : i32, i32, i32
  }
  func.func @transform_9(%arg0: i32) -> (i32, i32, i32) {
    %c0_i32 = arith.constant 0 : i32
    %c0_i32_0 = arith.constant 0 : i32
    %c0_i32_1 = arith.constant 0 : i32
    return %arg0, %c0_i32, %c0_i32_0 : i32, i32, i32
  }
  func.func @transform_10(%arg0: i32) -> (i32, i32, i32) {
    %c0_i32 = arith.constant 0 : i32
    %c0_i32_0 = arith.constant 0 : i32
    %c0_i32_1 = arith.constant 0 : i32
    return %arg0, %c0_i32, %c0_i32_0 : i32, i32, i32
  }
  func.func @transform_11(%arg0: i32) -> (i32, i32, i32) {
    %c0_i32 = arith.constant 0 : i32
    %c0_i32_0 = arith.constant 0 : i32
    %c0_i32_1 = arith.constant 0 : i32
    return %arg0, %c0_i32, %c0_i32_0 : i32, i32, i32
  }
  func.func @transform_12(%arg0: i32) -> (i32, i32, i32) {
    %c0_i32 = arith.constant 0 : i32
    %c0_i32_0 = arith.constant 0 : i32
    %c0_i32_1 = arith.constant 0 : i32
    return %arg0, %c0_i32, %c0_i32_0 : i32, i32, i32
  }
  func.func @transform_13(%arg0: i32) -> (i32, i32, i32) {
    %c0_i32 = arith.constant 0 : i32
    %c0_i32_0 = arith.constant 0 : i32
    %c0_i32_1 = arith.constant 0 : i32
    return %arg0, %c0_i32, %c0_i32_0 : i32, i32, i32
  }
  func.func @transform_14(%arg0: i32) -> (i32, i32, i32) {
    %c0_i32 = arith.constant 0 : i32
    %c0_i32_0 = arith.constant 0 : i32
    %c0_i32_1 = arith.constant 0 : i32
    return %arg0, %c0_i32, %c0_i32_0 : i32, i32, i32
  }
  func.func @transform_15(%arg0: i32) -> (i32, i32, i32) {
    %c0_i32 = arith.constant 0 : i32
    %c0_i32_0 = arith.constant 0 : i32
    %c0_i32_1 = arith.constant 0 : i32
    return %arg0, %c0_i32, %c0_i32_0 : i32, i32, i32
  }
  func.func @transform_16(%arg0: i32) -> (i32, i32) {
    %c0_i32 = arith.constant 0 : i32
    %c0_i32_0 = arith.constant 0 : i32
    %c0_i32_1 = arith.constant 0 : i32
    return %c0_i32, %c0_i32_0 : i32, i32
  }
  func.func @transform_17(%arg0: i32) -> (i32, i32) {
    %c0_i32 = arith.constant 0 : i32
    %c0_i32_0 = arith.constant 0 : i32
    %c0_i32_1 = arith.constant 0 : i32
    return %c0_i32, %c0_i32_0 : i32, i32
  }
  func.func @transform_18(%arg0: i32) -> (i32, i32) {
    %c0_i32 = arith.constant 0 : i32
    %c0_i32_0 = arith.constant 0 : i32
    %c0_i32_1 = arith.constant 0 : i32
    return %c0_i32, %c0_i32_0 : i32, i32
  }
  func.func @transform_19(%arg0: i32) -> (i32, i32) {
    %c0_i32 = arith.constant 0 : i32
    %c0_i32_0 = arith.constant 0 : i32
    %c0_i32_1 = arith.constant 0 : i32
    return %c0_i32, %c0_i32_0 : i32, i32
  }
  func.func @transform_20(%arg0: i32) -> (i32, i32) {
    %c0_i32 = arith.constant 0 : i32
    %c0_i32_0 = arith.constant 0 : i32
    %c0_i32_1 = arith.constant 0 : i32
    return %c0_i32, %c0_i32_0 : i32, i32
  }
}

</mosaic_0001>

<bundles_post_ra>
// kernel: tpu_custom_call.1
= control target key start
LH: loop header
LB: loop body
LE: loop exit
PB: predicated region body
PF: predicated region fallthrough
CT: control target
= control target key end

     0   :  { %s5471_s0 = inlined_call_operand.vmem [shape: f32[2,8,16], index: 0, kind: input, shape index: {}]   ;;  %s5472_s1 = inlined_call_operand.vmem [shape: f32[2,1,32], index: 1, kind: input, shape index: {}]   ;;  %s5473_s2 = inlined_call_operand.vmem [shape: bf16[16,32], index: 2, kind: input, shape index: {}]   ;;  %s5474_s3 = inlined_call_operand.vmem [shape: f32[1,32], index: 3, kind: input, shape index: {}]   ;;  %s5475_s4 = inlined_call_operand.vmem [shape: bf16[2,32,96], index: 4, kind: input, shape index: {}]   ;;  %s5476_s5 = inlined_call_operand.vmem [shape: f32[2,1,96], index: 5, kind: input, shape index: {}]   ;;  %s5477_s6 = inlined_call_operand.vmem [shape: bf16[2,32,32], index: 6, kind: input, shape index: {}]   ;;  %s5478_s7 = inlined_call_operand.vmem [shape: f32[2,1,32], index: 7, kind: input, shape index: {}]   ;;  %s5479_s8 = inlined_call_operand.vmem [shape: f32[2,1,32], index: 8, kind: input, shape index: {}]   ;;  %s5480_s9 = inlined_call_operand.vmem [shape: f32[2,1,32], index: 9, kind: input, shape index: {}]   ;;  %s5481_s10 = inlined_call_operand.vmem [shape: f32[2,1,32], index: 10, kind: input, shape index: {}]   ;;  %s5482_s11 = inlined_call_operand.vmem [shape: f32[2,1,32], index: 11, kind: input, shape index: {}]   ;;  %s5483_s12 = inlined_call_operand.vmem [shape: bf16[2,32,2048], index: 12, kind: input, shape index: {}]   ;;  %s5484_s13 = inlined_call_operand.vmem [shape: f32[2,1,2048], index: 13, kind: input, shape index: {}]   ;;  %s5485_s14 = inlined_call_operand.vmem [shape: bf16[2,2048,32], index: 14, kind: input, shape index: {}]   ;;  %s5486_s15 = inlined_call_operand.vmem [shape: f32[2,1,32], index: 15, kind: input, shape index: {}]   ;;  %s5487_s16 = inlined_call_operand.vmem [shape: bf16[32,128], index: 16, kind: input, shape index: {}]   ;;  %s5488_s17 = inlined_call_operand.vmem [shape: f32[1,128], index: 17, kind: input, shape index: {}]   ;;  %s5489_s18 = inlined_call_operand.vmem [shape: bf16[128,8], index: 18, kind: input, shape index: {}]   ;;  %s5490_s19 = inlined_call_operand.vmem [shape: f32[1,8], index: 19, kind: input, shape index: {}]   ;;  %s5491_s20 = inlined_call_operand.hbm [shape: f32[2,8], index: 20, kind: output, shape index: {}]  }
   0x1   :  { %5498 = sst [smem:[#allocation8_spill]] %s5471_s0 }
   0x2   :  { %5499 = sst [smem:[#allocation9_spill]] %s5472_s1 }
   0x3   :  { %5500 = sst [smem:[#allocation10_spill]] %s5473_s2 }
   0x4   :  { %5501 = sst [smem:[#allocation11_spill]] %s5474_s3 }
   0x5   :  { %5502 = sst [smem:[#allocation12_spill]] %s5475_s4 }
   0x6   :  { %5503 = sst [smem:[#allocation13_spill]] %s5477_s6 }
   0x7   :  { %5504 = sst [smem:[#allocation14_spill]] %s5487_s16 }
   0x8   :  { %5505 = sst [smem:[#allocation15_spill]] %s5488_s17 }
   0x9   :  { %5506 = sst [smem:[#allocation16_spill]] %s5489_s18 }
   0xa   :  { %5507 = sst [smem:[#allocation17_spill]] %s5490_s19 }
   0xb   :  { %5508 = sst [smem:[#allocation18_spill]] %s5491_s20 }
   0xc   :  { %25 = vsyncpa [#allocation4], 0  ;;  %s4829_s1 = smov 0  }
   0xd LB: > { %5509 = sst [smem:[#allocation6_spill]] %s4712_s1  ;;  %s4835_s22 = sadd.s32 4294967295, %s4712_s1   ;;  %s4712_s1 = sphi %s4829_s1, %s31_s1  }
   0xe   : > { %p3648_p0 = scmp.ge.s32.totalorder %s4712_s1, 1  ;;  %p653_p1 = scmp.lt.s32.totalorder %s4712_s1, 3 }
  0x10   : > { %p654_p2 = pnand %p3648_p0, %p653_p1 }
  0x12   : > { %657 = sbr.rel (%p654_p2) target bundleno = 2622 (0xa3e), region = 100 }
  0x17   : > { %p746_p3 = scmp.lt.s32.totalorder %s4835_s22, 1  ;;  %s5510_s28 = sld [smem:[#allocation12_spill]] }
  0x18   : > { %s5511_s6 = sld [smem:[#allocation13_spill]]  ;;  %p3658_p4 = scmp.ne.s32.totalorder %s4835_s22, 0 }
  0x19   : > { %s4841_s23 = scalar_select %p746_p3, %s4835_s22, 1 }
  0x1a   : > { %s5513_s29 = sld [smem:[#allocation10_spill]] (!%p3658_p4) }
  0x1b   : > { %s4402_s24 = sshll.u32 %s4841_s23, 4  ;;  %s761_s20 = scalar_lea.vmem %s5478_s7, %s4841_s23 }
  0x1c   : > { %s4887_s18 = scalar_lea.vmem %s5484_s13, %s4402_s24  ;;  %s4405_s2 = sshll.u32 %s4841_s23, 10 }
  0x1d   : > { %s4851_s4 = scalar_lea.vmem %s5510_s28, %s4402_s24  ;;  %s790_s26 = scalar_lea.vmem %s5486_s15, %s4841_s23 }
  0x1e   : > { %s4856_s0 = scalar_lea.vmem %s5511_s6, %s4402_s24  ;;  %s4404_s6 = sshll.u32 %s4841_s23, 8 }
  0x1f   : > { %5512 = sst [smem:[#allocation7_spill]] %s4856_s0  ;;  %s4882_s21 = scalar_lea.vmem %s5483_s12, %s4404_s6 }
  0x20   : > { %s4897_s16 = scalar_lea.vmem %s5485_s14, %s4405_s2  ;;  %795 = sbr.rel (%p3658_p4) target bundleno = 181 (0xb5), region = 104 }
  0x21   : > { %s5514_s17 = sld [smem:[#allocation8_spill]] (!%p3658_p4) }
  0x22   : > { %s5515_s2 = sld [smem:[#allocation11_spill]] (!%p3658_p4) }
  0x23   : > { %s5516_s6 = sld [smem:[#allocation9_spill]] (!%p3658_p4) }
  0x25   : > { %v4406_v0 = vld [vmem:[%s5513_s29] sm:$0xff]  ;;  %vm812_vm0 = vcmask 130048   ;;  %vm841_vm1 = vcmask 261120  }
  0x26   : > { %823 = vmatpush.bf16.msra.mxu0 %v4406_v0 }
  0x27   : > { %v796_v1 = vld [vmem:[%s5514_s17] sm:$0xff]  ;;  %v3659_v2 = vld [vmem:[%s5514_s17 + $0x8] sm:$0xff] }
  0x28   : > { %v799_v3 = vpack.c.bf16 %v3659_v2, %v796_v1  ;;  %v4605_v4 = vld [vmem:[%s5515_s2] ss:$0 sm:$0xff] }
  0x29   : > { %v4606_v5 = vld [vmem:[%s5516_s6] ss:$0 sm:$0xff]  ;;  %v4607_v9 = vld [vmem:[%s5516_s6 + $0x1] ss:$0 sm:$0xff] }
  0x2a   : > { %3664 = vmatmul.msk.bf16.vlgmr.msra.gmra.mxu0 %vm812_vm0, %v799_v3 }
  0xa7   : > { %v825_v6 = vpop.f32.mrf.mxu0 }
  0xa8   : > { %v826_v7 = vadd.f32 %v4605_v4, %v825_v6 }
  0xaa   : > { %v839_v8 = vadd.f32 %v4606_v5, %v826_v7 }
  0xac   : > { %842 = vst.msk [vmem:[#allocation2] sm:$0xff] %vm841_vm1, %v839_v8 }
  0xaf   : > { %v827_v10 = vpop.f32.mrf.mxu0 }
  0xb0   : > { %v828_v11 = vadd.f32 %v4605_v4, %v827_v10 }
  0xb2   : > { %v840_v12 = vadd.f32 %v4607_v9, %v828_v11 }
  0xb4   : > { %843 = vst.msk [vmem:[#allocation2 + $0x8] sm:$0xff] %vm841_vm1, %v840_v12 }
  0xb5 PF: > { %v4408_v13 = vld [vmem:[%s4851_s4 + $0x8] sm:$0xff]  ;;  %v4407_v14 = vld [vmem:[%s4851_s4] sm:$0xff]  ;;  %vm867_vm2 = vcmask 261120   ;;  %s5517_s24 = scalar_lea.vmem %s5476_s5, %s4841_s23  ;;  %s4714_s4 = smov 104   ;;  %vm948_vm3 = vcmask 64512   ;;  %vm1237_vm4 = vcmask 1043456  }
  0xb6   : > { %v4920_v15 = vld [vmem:[#allocation2] sm:$0xff]  ;;  %877 = vmatpush.bf16.msra.mxu0 %v4408_v13  ;;  %s4715_s19 = smov 120   ;;  %s4716_s3 = smov 112   ;;  %vm1414_vm5 = vcmask 130048   ;;  %vm1416_vm6 = vcmask 195584  }
  0xb7   : > { %v4623_v18 = vld [vmem:[%s5517_s24] ss:$0 sm:$0xff]  ;;  %s4717_s28 = smov 96   ;;  %s4718_s2 = smov 64  }
  0xb8   : > { %s4719_s25 = smov 8   ;;  %s5518_s27 = sld [smem:[#allocation7_spill]] }
  0xb9   : > { %s4720_s0 = smov 16   ;;  %s4721_s30 = smov 24  }
  0xba   : > { %878 = vmatpush.bf16.msra.mxu0 %v4407_v14  ;;  %p4356_p5 = scmp.ne.s32.totalorder %s4835_s22, 1 }
  0xbb   : > { %v4922_v16 = vld [vmem:[#allocation2 + $0x8] sm:$0xff]  ;;  %s5523_s29 = sld [smem:[#allocation14_spill]] (!%p4356_p5) }
  0xbc   : > { %v846_v17 = vpack.c.bf16 %v4922_v16, %v4920_v15  ;;  %s5524_s24 = sld [smem:[#allocation16_spill]] (!%p4356_p5) }
  0xbe   : > { %3674 = vmatmul.msk.bf16.vlgmr.msra.gmra.mxu0 %vm867_vm2, %v846_v17 }
 0x13b   : > { %v880_v19 = vpop.f32.mrf.mxu0 }
 0x13c   : > { %v881_v20 = vadd.f32 %v4623_v18, %v880_v19 }
 0x13e   : > { %922 = vrot.lane.b32.xlu1 %v881_v20, %s4714_s4  ;;  %916 = vrot.lane.b32.xlu0 %v881_v20, %s4715_s19  ;;  %v4938_v23 = vmul.f32 0.35355338, %v881_v20  ;;  %v935_v46 = vpack.c.bf16 %v881_v20, %v881_v20 }
 0x140   : > { %v944_v48 = vunpack.c.l.b16 %v935_v46 }
 0x142   : > { %v4974_v50 = vpack.c.b16 %v944_v48, %v944_v48 }
 0x143   : > { %v882_v21 = vpop.f32.mrf.mxu0 }
 0x144   : > { %v883_v22 = vadd.f32 %v4623_v18, %v882_v21  ;;  %v907_v18 = vpack.c.bf16 %v4938_v23, %v4938_v23 }
 0x146   : > { %929 = vrot.lane.b32.xlu2 %v883_v22, %s4716_s3  ;;  %926 = vrot.lane.b32.xlu1 %v883_v22, %s4715_s19  ;;  %v4958_v43 = vmul.f32 0.35355338, %v883_v22  ;;  %v939_v52 = vpack.c.bf16 %v883_v22, %v883_v22 }
 0x147   : > { %919 = vrot.lane.b32.xlu0 %v881_v20, %s4716_s3 }
 0x148   : > { %v1041_v53 = vunpack.c.l.b16 %v939_v52 }
 0x14a   : > { %v4982_v54 = vpack.c.b16 %v1041_v53, %v1041_v53 }
 0x14e   : > { %932 = vrot.lane.b32.xlu2 %v883_v22, %s4714_s4  ;;  %v911_v22 = vpack.c.bf16 %v4958_v43, %v4958_v43 }
 0x156   : > { %888 = vrot.lane.b32.xlu2 %v4938_v23, %s4715_s19 }
 0x1a0   : > { %v930_v32 = vpop.permute.xlu2 %929 }
 0x1a1   : > { %v941_v36 = vpack.c.bf16 %v930_v32, %v930_v32 }
 0x1a3   : > { %v1089_v40 = vunpack.c.l.b16 %v941_v36 }
 0x1a5   : > { %v4956_v42 = vpack.c.b16 %v1089_v40, %v1089_v40 }
 0x1a8   : > { %v933_v45 = vpop.permute.xlu2 %932 }
 0x1a9   : > { %v942_v47 = vpack.c.bf16 %v933_v45, %v933_v45 }
 0x1ab   : > { %v1113_v49 = vunpack.c.l.b16 %v942_v47 }
 0x1ad   : > { %v4976_v51 = vpack.c.b16 %v1113_v49, %v1113_v49 }
 0x1b0   : > { %v923_v24 = vpop.permute.xlu1 %922  ;;  %v917_v25 = vpop.permute.xlu0 %916 }
 0x1b1   : > { %v936_v26 = vpack.c.bf16 %v917_v25, %v917_v25  ;;  %v938_v38 = vpack.c.bf16 %v923_v24, %v923_v24  ;;  %v889_v55 = vpop.permute.xlu2 %888 }
 0x1b2   : > { %v908_v60 = vpack.c.bf16 %v889_v55, %v889_v55 }
 0x1b3   : > { %v969_v27 = vunpack.c.l.b16 %v936_v26  ;;  %v1017_v41 = vunpack.c.l.b16 %v938_v38 }
 0x1b5   : > { %v4942_v28 = vpack.c.b16 %v969_v27, %v969_v27  ;;  %v4960_v44 = vpack.c.b16 %v1017_v41, %v1017_v41 }
 0x1b7   : > { %971 = vrot.lane.b32.xlu0 %v4942_v28, %s4717_s28 }
 0x1b8   : > { %v927_v29 = vpop.permute.xlu1 %926 }
 0x1b9   : > { %v940_v30 = vpack.c.bf16 %v927_v29, %v927_v29  ;;  %v920_v31 = vpop.permute.xlu0 %919 }
 0x1ba   : > { %v937_v33 = vpack.c.bf16 %v920_v31, %v920_v31 }
 0x1bb   : > { %v1065_v34 = vunpack.c.l.b16 %v940_v30 }
 0x1bc   : > { %v993_v35 = vunpack.c.l.b16 %v937_v33 }
 0x1bd   : > { %v4946_v37 = vpack.c.b16 %v1065_v34, %v1065_v34 }
 0x1be   : > { %v4948_v39 = vpack.c.b16 %v993_v35, %v993_v35 }
 0x1bf   : > { %891 = vrot.lane.b32.xlu0 %v4938_v23, %s4716_s3  ;;  %1067 = vrot.lane.b32.xlu2 %v4946_v37, %s4717_s28 }
 0x1c0   : > { %995 = vrot.lane.b32.xlu1 %v4948_v39, %s4717_s28 }
 0x1c7   : > { %1091 = vrot.lane.b32.xlu0 %v4956_v42, %s4717_s28  ;;  %898 = vrot.lane.b32.xlu2 %v4958_v43, %s4715_s19 }
 0x1c8   : > { %1019 = vrot.lane.b32.xlu1 %v4960_v44, %s4717_s28 }
 0x1cf   : > { %901 = vrot.lane.b32.xlu0 %v4958_v43, %s4716_s3  ;;  %904 = vrot.lane.b32.xlu2 %v4958_v43, %s4714_s4  ;;  %s5525_s3 = sld [smem:[#allocation15_spill]] (!%p4356_p5) }
 0x1d0   : > { %894 = vrot.lane.b32.xlu1 %v4938_v23, %s4714_s4  ;;  %s5519_s4 = scalar_lea.vmem %s5479_s8, %s4841_s23 }
 0x1d7   : > { %946 = vrot.lane.b32.xlu0 %v4974_v50, %s4717_s28 }
 0x1d8   : > { %1115 = vrot.lane.b32.xlu1 %v4976_v51, %s4717_s28 }
 0x1e0   : > { %1043 = vrot.lane.b32.xlu1 %v4982_v54, %s4717_s28  ;;  %s5520_s28 = scalar_lea.vmem %s5480_s9, %s4841_s23 }
 0x219   : > { %v1068_v56 = vpop.permute.xlu2 %1067 }
 0x21a   : > { %v1073_v59 = vsel %vm948_vm3, %v1068_v56, 0 }
 0x221   : > { %v899_v5 = vpop.permute.xlu2 %898 }
 0x222   : > { %v912_v6 = vpack.c.bf16 %v899_v5, %v899_v5 }
 0x229   : > { %v972_v57 = vpop.permute.xlu0 %971  ;;  %v905_v17 = vpop.permute.xlu2 %904 }
 0x22a   : > { %v977_v58 = vsel %vm948_vm3, %v972_v57, 0  ;;  %v914_v20 = vpack.c.bf16 %v905_v17, %v905_v17 }
 0x22b   : > { %986 = vmatpush.bf16.xpose.msra.mxu2 %v977_v58 }
 0x231   : > { %v892_v61 = vpop.permute.xlu0 %891 }
 0x232   : > { %v996_v62 = vpop.permute.xlu1 %995  ;;  %3676 = vmatmul.msk.bf16.vlgmr.msra.gmra.mxu2 %vm948_vm3, %v908_v60  ;;  %v909_v0 = vpack.c.bf16 %v892_v61, %v892_v61 }
 0x233   : > { %1082 = vmatpush.bf16.xpose.msrb.mxu2 %v1073_v59  ;;  %v1001_v63 = vsel %vm948_vm3, %v996_v62, 0 }
 0x234   : > { %1010 = vmatpush.bf16.xpose.msra.mxu3 %v1001_v63 }
 0x239   : > { %v1092_v1 = vpop.permute.xlu0 %1091 }
 0x23a   : > { %v1020_v2 = vpop.permute.xlu1 %1019  ;;  %v1097_v3 = vsel %vm948_vm3, %v1092_v1, 0 }
 0x23b   : > { %3677 = vmatmul.msk.bf16.vlgmr.msra.gmra.mxu3 %vm948_vm3, %v909_v0  ;;  %v1025_v4 = vsel %vm948_vm3, %v1020_v2, 0 }
 0x23c   : > { %1034 = vmatpush.bf16.xpose.msrb.mxu0 %v1025_v4  ;;  %1106 = vmatpush.bf16.xpose.msrb.mxu3 %v1097_v3 }
 0x241   : > { %v902_v7 = vpop.permute.xlu0 %901 }
 0x242   : > { %v895_v8 = vpop.permute.xlu1 %894  ;;  %3680 = vmatmul.msk.bf16.vlgmr.msrb.gmra.mxu2 %vm948_vm3, %v912_v6  ;;  %v913_v10 = vpack.c.bf16 %v902_v7, %v902_v7 }
 0x243   : > { %v910_v9 = vpack.c.bf16 %v895_v8, %v895_v8 }
 0x245   : > { %3678 = vmatmul.msk.bf16.vlgmr.msrb.gmra.mxu0 %vm948_vm3, %v910_v9 }
 0x249   : > { %v947_v11 = vpop.permute.xlu0 %946 }
 0x24a   : > { %v1116_v12 = vpop.permute.xlu1 %1115  ;;  %v953_v13 = vsel %vm948_vm3, %v947_v11, 0 }
 0x24b   : > { %v1121_v14 = vsel %vm948_vm3, %v1116_v12, 0  ;;  %3681 = vmatmul.msk.bf16.vlgmr.msrb.gmra.mxu3 %vm948_vm3, %v913_v10  ;;  %962 = vmatpush.bf16.xpose.msra.mxu1 %v953_v13 }
 0x24c   : > { %1130 = vmatpush.bf16.xpose.msra.mxu0 %v1121_v14 }
 0x252   : > { %v1044_v19 = vpop.permute.xlu1 %1043  ;;  %3675 = vmatmul.msk.bf16.vlgmr.msra.gmra.mxu1 %vm948_vm3, %v907_v18 }
 0x253   : > { %v1049_v21 = vsel %vm948_vm3, %v1044_v19, 0 }
 0x254   : > { %1058 = vmatpush.bf16.xpose.msrb.mxu1 %v1049_v21 }
 0x255   : > { %3682 = vmatmul.msk.bf16.vlgmr.msra.gmra.mxu0 %vm948_vm3, %v914_v20 }
 0x262   : > { %3679 = vmatmul.msk.bf16.vlgmr.msrb.gmra.mxu1 %vm948_vm3, %v911_v22 }
 0x2b5   : > { %v988_v24 = vpop.f32.mrf.mxu2 }
 0x2b6   : > { %v1139_v25 = vsel %vm948_vm3, %v988_v24, -inf }
 0x2b7   : > { %1140 = vmax.xlane.f32.xlu2 %v1139_v25 }
 0x2bd   : > { %v990_v26 = vpop.f32.mrf.mxu2 }
 0x2be   : > { %v1012_v23 = vpop.f32.mrf.mxu3 }
 0x2bf   : > { %v1142_v27 = vsel %vm948_vm3, %v1012_v23, -inf }
 0x2c0   : > { %1143 = vmax.xlane.f32.xlu0 %v1142_v27 }
 0x2c2   : > { %v1036_v29 = vpop.f32.mrf.mxu0 }
 0x2c3   : > { %v1145_v47 = vsel %vm948_vm3, %v1036_v29, -inf }
 0x2c5   : > { %v1084_v30 = vpop.f32.mrf.mxu2 }
 0x2c6   : > { %v1014_v31 = vpop.f32.mrf.mxu3  ;;  %v1151_v32 = vsel %vm948_vm3, %v1084_v30, -inf }
 0x2c7   : > { %1152 = vmax.xlane.f32.xlu2 %v1151_v32 }
 0x2ca   : > { %v1038_v33 = vpop.f32.mrf.mxu0 }
 0x2cd   : > { %v1086_v34 = vpop.f32.mrf.mxu2 }
 0x2ce   : > { %v1108_v35 = vpop.f32.mrf.mxu3 }
 0x2cf   : > { %v1154_v36 = vsel %vm948_vm3, %v1108_v35, -inf  ;;  %v5010_v38 = vpop.f32.mrf.mxu1 }
 0x2d0   : > { %1155 = vmax.xlane.f32.xlu2 %v1154_v36  ;;  %v1136_v40 = vsel %vm948_vm3, %v5010_v38, -inf }
 0x2d1   : > { %1137 = vmax.xlane.f32.xlu1 %v1136_v40 }
 0x2d2   : > { %v5014_v41 = vpop.f32.mrf.mxu0 }
 0x2d3   : > { %v1157_v43 = vsel %vm948_vm3, %v5014_v41, -inf }
 0x2d4   : > { %1158 = vmax.xlane.f32.xlu0 %v1157_v43 }
 0x2d6   : > { %v1110_v45 = vpop.f32.mrf.mxu3 }
 0x2d7   : > { %v966_v46 = vpop.f32.mrf.mxu1 }
 0x2d9   : > { %1146 = vmax.xlane.f32.xlu1 %v1145_v47 }
 0x2da   : > { %v1134_v48 = vpop.f32.mrf.mxu0 }
 0x2df   : > { %v5019_v49 = vpop.f32.mrf.mxu1 }
 0x2e0   : > { %v1148_v52 = vsel %vm948_vm3, %v5019_v49, -inf }
 0x2e1   : > { %1149 = vmax.xlane.f32.xlu0 %v1148_v52 }
 0x2e7   : > { %v1062_v53 = vpop.f32.mrf.mxu1 }
 0x2f5   : > { %1296 = vrot.lane.b32.xlu0 %v4960_v44, %s4718_s2 }
 0x2fd   : > { %1338 = vrot.lane.b32.xlu0 %v4946_v37, %s4718_s2 }
 0x305   : > { %1359 = vrot.lane.b32.xlu0 %v4956_v42, %s4718_s2 }
 0x32a   : > { %v1141_v55 = vpop.xlane.xlu2 %1140 }
 0x32b   : > { %v1161_v56 = vsub.f32 %v988_v24, %v1141_v55 }
 0x32d   : > { %v1170_v57 = vmul.f32 1.442695, %v1161_v56 }
 0x32f   : > { %4630 = vpow2.f32 %v1170_v57 }
 0x333   : > { %v1144_v58 = vpop.xlane.xlu0 %1143 }
 0x334   : > { %v1162_v59 = vsub.f32 %v1012_v23, %v1144_v58 }
 0x335   : > { %v5029_v60 = vpop.eup %4630 }
 0x336   : > { %v1172_v61 = vmul.f32 1.442695, %v1162_v59  ;;  %v1187_v62 = vsel %vm948_vm3, %v5029_v60, 0.0 }
 0x337   : > { %1188 = vadd.xlane.f32.xlu2 %v1187_v62 }
 0x338   : > { %4632 = vpow2.f32 %v1172_v61 }
 0x33a   : > { %v1153_v44 = vpop.xlane.xlu2 %1152 }
 0x33b   : > { %v1165_v63 = vsub.f32 %v1084_v30, %v1153_v44 }
 0x33d   : > { %v1178_v37 = vmul.f32 1.442695, %v1165_v63 }
 0x33e   : > { %v5033_v0 = vpop.eup %4632 }
 0x33f   : > { %4634 = vpow2.f32 %v1178_v37  ;;  %v1190_v42 = vsel %vm948_vm3, %v5033_v0, 0.0 }
 0x340   : > { %1191 = vadd.xlane.f32.xlu0 %v1190_v42 }
 0x343   : > { %v1156_v11 = vpop.xlane.xlu2 %1155 }
 0x344   : > { %v1138_v1 = vpop.xlane.xlu1 %1137  ;;  %v1166_v12 = vsub.f32 %v1108_v35, %v1156_v11 }
 0x345   : > { %v5037_v2 = vpop.eup %4634  ;;  %v1160_v18 = vsub.f32 %v5010_v38, %v1138_v1 }
 0x346   : > { %v1199_v3 = vsel %vm948_vm3, %v5037_v2, 0.0 }
 0x347   : > { %v1159_v8 = vpop.xlane.xlu0 %1158  ;;  %v1168_v19 = vmul.f32 1.442695, %v1160_v18 }
 0x348   : > { %1200 = vadd.xlane.f32.xlu0 %v1199_v3  ;;  %v1167_v22 = vsub.f32 %v5014_v41, %v1159_v8 }
 0x34a   : > { %v1182_v24 = vmul.f32 1.442695, %v1167_v22 }
 0x34c   : > { %v1147_v4 = vpop.xlane.xlu1 %1146 }
 0x34d   : > { %v1163_v5 = vsub.f32 %v1036_v29, %v1147_v4 }
 0x34f   : > { %v1174_v6 = vmul.f32 1.442695, %v1163_v5  ;;  %1254 = vrot.lane.b32.xlu2 %v4942_v28, %s4718_s2  ;;  %v1180_v28 = vmul.f32 1.442695, %v1166_v12 }
 0x351   : > { %4636 = vpow2.f32 %v1174_v6 }
 0x352   : > { %4638 = vpow2.f32 %v1180_v28 }
 0x353   : > { %4640 = vpow2.f32 %v1168_v19 }
 0x354   : > { %v1150_v10 = vpop.xlane.xlu0 %1149  ;;  %4642 = vpow2.f32 %v1182_v24 }
 0x357   : > { %v5043_v7 = vpop.eup %4636 }
 0x358   : > { %v1193_v9 = vsel %vm948_vm3, %v5043_v7, 0.0  ;;  %v5052_v17 = vpop.eup %4638 }
 0x359   : > { %1194 = vadd.xlane.f32.xlu1 %v1193_v9  ;;  %v5057_v20 = vpop.eup %4640 }
 0x35a   : > { %v1184_v21 = vsel %vm948_vm3, %v5057_v20, 0.0  ;;  %v5065_v26 = vpop.eup %4642 }
 0x35b   : > { %v1205_v23 = vsel %vm948_vm3, %v5065_v26, 0.0 }
 0x35c   : > { %1380 = vrot.lane.b32.xlu0 %v4976_v51, %s4718_s2  ;;  %v1202_v51 = vsel %vm948_vm3, %v5052_v17, 0.0 }
 0x367   : > { %v1297_v13 = vpop.permute.xlu0 %1296 }
 0x368   : > { %v1302_v14 = vsel %vm1237_vm4, %v1297_v13, 0 }
 0x369   : > { %1311 = vmatpush.bf16.msrb.mxu0 %v1302_v14 }
 0x36f   : > { %v1339_v29 = vpop.permute.xlu0 %1338 }
 0x370   : > { %v1344_v38 = vsel %vm1237_vm4, %v1339_v29, 0 }
 0x372   : > { %1275 = vrot.lane.b32.xlu1 %v4948_v39, %s4718_s2  ;;  %v1164_v39 = vsub.f32 %v5019_v49, %v1150_v10 }
 0x374   : > { %v1176_v25 = vmul.f32 1.442695, %v1164_v39 }
 0x376   : > { %4644 = vpow2.f32 %v1176_v25 }
 0x378   : > { %1203 = vadd.xlane.f32.xlu2 %v1202_v51 }
 0x37c   : > { %v5069_v27 = vpop.eup %4644 }
 0x37d   : > { %v1196_v30 = vsel %vm948_vm3, %v5069_v27, 0.0 }
 0x386   : > { %1185 = vadd.xlane.f32.xlu0 %v1184_v21 }
 0x390   : > { %1232 = vrot.lane.b32.xlu2 %v4974_v50, %s4718_s2  ;;  %v1360_v50 = vpop.permute.xlu0 %1359 }
 0x391   : > { %v1365_v59 = vsel %vm1237_vm4, %v1360_v50, 0 }
 0x39c   : > { %1206 = vadd.xlane.f32.xlu1 %v1205_v23 }
 0x3a4   : > { %1197 = vadd.xlane.f32.xlu1 %v1196_v30 }
 0x3aa   : > { %v1189_v31 = vpop.xlane.xlu2 %1188 }
 0x3ab   : > { %4646 = vrcp.f32 %v1189_v31 }
 0x3b1   : > { %v4647_v32 = vpop.eup %4646 }
 0x3b2   : > { %v1217_v33 = vmul.f32 %v4647_v32, %v5029_v60  ;;  %v1255_v34 = vpop.permute.xlu2 %1254  ;;  %v4410_v32 = vld [vmem:[%s5518_s27 + $0x8] sm:$0xff] }
 0x3b3   : > { %v1260_v35 = vsel %vm1237_vm4, %v1255_v34, 0  ;;  %v1192_v36 = vpop.xlane.xlu0 %1191 }
 0x3b4   : > { %v1225_v40 = vpack.c.bf16 %v1217_v33, %v1217_v33  ;;  %1269 = vmatpush.bf16.msra.mxu2 %v1260_v35  ;;  %v4409_v33 = vld [vmem:[%s5518_s27] sm:$0xff] }
 0x3b7   : > { %3684 = vmatmul.msk.bf16.vlgmr.msra.gmra.mxu2 %vm948_vm3, %v1225_v40 }
 0x3b8   : > { %1353 = vmatpush.bf16.msrb.mxu2 %v1344_v38 }
 0x3bb   : > { %v1201_v41 = vpop.xlane.xlu0 %1200 }
 0x3bc   : > { %4648 = vrcp.f32 %v1201_v41 }
 0x3bd   : > { %1317 = vrot.lane.b32.xlu1 %v4982_v54, %s4718_s2  ;;  %s5521_s2 = scalar_lea.vmem %s5481_s10, %s4841_s23 }
 0x3c2   : > { %v4649_v43 = vpop.eup %4648 }
 0x3c3   : > { %v1221_v45 = vmul.f32 %v4649_v43, %v5037_v2 }
 0x3c5   : > { %v1229_v46 = vpack.c.bf16 %v1221_v45, %v1221_v45 }
 0x3c7   : > { %3688 = vmatmul.msk.bf16.vlgmr.msrb.gmra.mxu2 %vm948_vm3, %v1229_v46 }
 0x3cc   : > { %v1195_v47 = vpop.xlane.xlu1 %1194 }
 0x3cd   : > { %4650 = vrcp.f32 %v1195_v47 }
 0x3ce   : > { %v1381_v48 = vpop.permute.xlu0 %1380  ;;  %4652 = vrcp.f32 %v1192_v36 }
 0x3cf   : > { %v1386_v49 = vsel %vm1237_vm4, %v1381_v48, 0 }
 0x3d0   : > { %1395 = vmatpush.bf16.msra.mxu0 %v1386_v49 }
 0x3d3   : > { %v4651_v52 = vpop.eup %4650 }
 0x3d4   : > { %v1219_v53 = vmul.f32 %v4651_v52, %v5043_v7  ;;  %v4653_v54 = vpop.eup %4652 }
 0x3d5   : > { %v1218_v56 = vmul.f32 %v4653_v54, %v5033_v0 }
 0x3d6   : > { %v1227_v55 = vpack.c.bf16 %v1219_v53, %v1219_v53 }
 0x3d7   : > { %v1226_v60 = vpack.c.bf16 %v1218_v56, %v1218_v56  ;;  %v4624_v56 = vld [vmem:[%s761_s20] ss:$0 sm:$0xff] }
 0x3d8   : > { %3686 = vmatmul.msk.bf16.vlgmr.msrb.gmra.mxu0 %vm948_vm3, %v1227_v55 }
 0x3e4   : > { %v1276_v57 = vpop.permute.xlu1 %1275 }
 0x3e5   : > { %v1281_v58 = vsel %vm1237_vm4, %v1276_v57, 0 }
 0x3e6   : > { %1290 = vmatpush.bf16.msra.mxu3 %v1281_v58 }
 0x3e9   : > { %3685 = vmatmul.msk.bf16.vlgmr.msra.gmra.mxu3 %vm948_vm3, %v1226_v60 }
 0x3ea   : > { %1374 = vmatpush.bf16.msrb.mxu3 %v1365_v59 }
 0x3eb   : > { %v1204_v61 = vpop.xlane.xlu2 %1203 }
 0x3ec   : > { %4654 = vrcp.f32 %v1204_v61 }
 0x3f2   : > { %v4655_v62 = vpop.eup %4654 }
 0x3f3   : > { %v1222_v44 = vmul.f32 %v4655_v62, %v5052_v17  ;;  %v1233_v63 = vpop.permute.xlu2 %1232 }
 0x3f4   : > { %v1239_v37 = vsel %vm1237_vm4, %v1233_v63, 0 }
 0x3f5   : > { %1248 = vmatpush.bf16.msra.mxu1 %v1239_v37  ;;  %v1230_v0 = vpack.c.bf16 %v1222_v44, %v1222_v44  ;;  %v4722_v37 = vmov 32.0  }
 0x3f9   : > { %v1186_v42 = vpop.xlane.xlu0 %1185  ;;  %3689 = vmatmul.msk.bf16.vlgmr.msrb.gmra.mxu3 %vm948_vm3, %v1230_v0 }
 0x3fa   : > { %4656 = vrcp.f32 %v1186_v42 }
 0x400   : > { %v4657_v1 = vpop.eup %4656 }
 0x401   : > { %v1216_v2 = vmul.f32 %v4657_v1, %v5057_v20 }
 0x403   : > { %v1224_v3 = vpack.c.bf16 %v1216_v2, %v1216_v2 }
 0x405   : > { %3683 = vmatmul.msk.bf16.vlgmr.msra.gmra.mxu1 %vm948_vm3, %v1224_v3 }
 0x40f   : > { %v1207_v4 = vpop.xlane.xlu1 %1206 }
 0x410   : > { %4658 = vrcp.f32 %v1207_v4 }
 0x416   : > { %v4659_v5 = vpop.eup %4658 }
 0x417   : > { %v1223_v6 = vmul.f32 %v4659_v5, %v5065_v26  ;;  %v1198_v8 = vpop.xlane.xlu1 %1197 }
 0x418   : > { %4660 = vrcp.f32 %v1198_v8 }
 0x419   : > { %v1231_v7 = vpack.c.bf16 %v1223_v6, %v1223_v6  ;;  %4662 = vrcp.f32 %v4722_v37 }
 0x41b   : > { %3690 = vmatmul.msk.bf16.vlgmr.msra.gmra.mxu0 %vm948_vm3, %v1231_v7 }
 0x41e   : > { %v4661_v9 = vpop.eup %4660 }
 0x41f   : > { %v1220_v10 = vmul.f32 %v4661_v9, %v5069_v27  ;;  %v4663_v0 = vpop.eup %4662 }
 0x420   : > { %v1482_v42 = vmul.f32 32.0, %v4663_v0  ;;  %vm1486_vm7 = vweird.f32 %v4663_v0 }
 0x421   : > { %v1228_v13 = vpack.c.bf16 %v1220_v10, %v1220_v10 }
 0x422   : > { %v1483_v1 = vsub.f32 1.0, %v1482_v42  ;;  %v3726_v42 = vld [vmem:[%s4882_s21 + $0x18] sm:$0xf] }
 0x424   : > { %v1484_v2 = vmul.f32 %v4663_v0, %v1483_v1  ;;  %v4422_v1 = vld [vmem:[%s4882_s21 + $0x54] sm:$0xf0] }
 0x426   : > { %v1485_v3 = vadd.f32 %v4663_v0, %v1484_v2 }
 0x42f   : > { %v1318_v11 = vpop.permute.xlu1 %1317 }
 0x430   : > { %v1323_v12 = vsel %vm1237_vm4, %v1318_v11, 0 }
 0x431   : > { %1332 = vmatpush.bf16.msrb.mxu1 %v1323_v12 }
 0x434   : > { %3687 = vmatmul.msk.bf16.vlgmr.msrb.gmra.mxu1 %vm948_vm3, %v1228_v13  ;;  %v3766_v13 = vld [vmem:[%s4882_s21 + $0x80] sm:$0xf] }
 0x435   : > { %1463 = vmatpush.bf16.msra.mxu1 %v4410_v32  ;;  %v3710_v32 = vld [vmem:[%s4882_s21 + $0x8] sm:$0xf] }
 0x439   : > { %1464 = vmatpush.bf16.msra.mxu1 %v4409_v33 }
 0x43a   : > { %v1271_v14 = vpop.f32.mrf.mxu2 }
 0x442   : > { %v1273_v28 = vpop.f32.mrf.mxu2 }
 0x443   : > { %v4427_v28 = vld [vmem:[%s4882_s21 + $0x84] sm:$0xf] }
 0x44a   : > { %v1355_v17 = vpop.f32.mrf.mxu2 }
 0x44b   : > { %v4608_v18 = vpack.i.bf16 %v1355_v17, %v1271_v14  ;;  %v4435_v14 = vld [vmem:[%s4882_s21 + $0xbc] sm:$0xf0] }
 0x44c   : > { %v3767_v17 = vor.u32 %v4435_v14, %v3766_v13 }
 0x44d   : > { %4609 = vrot.lane.b32.xlu2 %v4608_v18, %s4719_s25  ;;  %v3768_v18 = vld [vmem:[%s4882_s21 + $0xc0] sm:$0xf0] }
 0x44e   : > { %1774 = vmatpush.bf16.msra.mxu2 %v3767_v17 }
 0x452   : > { %v1357_v51 = vpop.f32.mrf.mxu2 }
 0x453   : > { %v3774_v51 = vld [vmem:[%s4882_s21 + $0x88] sm:$0xf] }
 0x455   : > { %v1313_v19 = vpop.f32.mrf.mxu0 }
 0x45d   : > { %v1315_v20 = vpop.f32.mrf.mxu0 }
 0x46c   : > { %v1292_v21 = vpop.f32.mrf.mxu3 }
 0x474   : > { %v1294_v22 = vpop.f32.mrf.mxu3 }
 0x47c   : > { %v1376_v24 = vpop.f32.mrf.mxu3 }
 0x47d   : > { %v4613_v39 = vpack.i.bf16 %v1376_v24, %v1292_v21  ;;  %v3771_v21 = vor.u32 %v4427_v28, %v3768_v18  ;;  %v4428_v24 = vld [vmem:[%s4882_s21 + $0x8c] sm:$0xf] }
 0x47f   : > { %4614 = vrot.lane.b32.xlu2 %v4613_v39, %s4720_s0  ;;  %v3776_v39 = vld [vmem:[%s4882_s21 + $0xc8] sm:$0xf0]  ;;  %1788 = vmatpush.bf16.msra.mxu3 %v3771_v21  ;;  %s5522_s0 = scalar_lea.vmem %s5482_s11, %s4841_s23 }
 0x482   : > { %v1250_v25 = vpop.f32.mrf.mxu1 }
 0x484   : > { %v1378_v26 = vpop.f32.mrf.mxu3 }
 0x485   : > { %v3779_v26 = vor.u32 %v4428_v24, %v3776_v39 }
 0x487   : > { %1816 = vmatpush.bf16.msrb.mxu1 %v3779_v26  ;;  %v3798_v26 = vld [vmem:[%s4882_s21 + $0xa0] sm:$0xf] }
 0x48a   : > { %v1252_v23 = vpop.f32.mrf.mxu1 }
 0x48b   : > { %v3702_v23 = vld [vmem:[%s4882_s21] sm:$0xf] }
 0x498   : > { %v1397_v27 = vpop.f32.mrf.mxu0 }
 0x499   : > { %v4618_v29 = vpack.i.bf16 %v1397_v27, %v1313_v19  ;;  %v4436_v19 = vld [vmem:[%s4882_s21 + $0xc4] sm:$0xf0]  ;;  %v4419_v27 = vld [vmem:[%s4882_s21 + $0x3c] sm:$0xf0] }
 0x49a   : > { %v3775_v22 = vor.u32 %v4436_v19, %v3774_v51  ;;  %v4625_v51 = vld [vmem:[%s5519_s4] ss:$0 sm:$0xff] }
 0x49b   : > { %4619 = vrot.lane.b32.xlu1 %v4618_v29, %s4721_s30  ;;  %v4411_v29 = vld [vmem:[%s4882_s21 + $0x4] sm:$0xf] }
 0x49c   : > { %1802 = vmatpush.bf16.msrb.mxu0 %v3775_v22  ;;  %v4626_v22 = vld [vmem:[%s5520_s28] ss:$0 sm:$0xff] }
 0x4a0   : > { %v1399_v30 = vpop.f32.mrf.mxu0 }
 0x4a7   : > { %v4610_v34 = vpop.permute.xlu2 %4609 }
 0x4a8   : > { %v4611_v36 = vunpack.i.l.bf16 %v4610_v34  ;;  %v4612_v41 = vunpack.i.h.bf16 %v4610_v34  ;;  %v4420_v34 = vld [vmem:[%s4882_s21 + $0x44] sm:$0xf0] }
 0x4aa   : > { %v1413_v45 = vsel %vm948_vm3, %v1250_v25, %v4611_v36  ;;  %v3712_v36 = vld [vmem:[%s4882_s21 + $0x48] sm:$0xf0] }
 0x4b1   : > { %v1334_v31 = vpop.f32.mrf.mxu1 }
 0x4b2   : > { %v1430_v46 = vsel %vm948_vm3, %v1334_v31, %v4612_v41  ;;  %v3703_v31 = vor.u32 %v4419_v27, %v3702_v23  ;;  %v4431_v23 = vld [vmem:[%s4882_s21 + $0xa4] sm:$0xf] }
 0x4b3   : > { %v3800_v27 = vld [vmem:[%s4882_s21 + $0xe0] sm:$0xf0] }
 0x4b4   : > { %1775 = vmatpush.bf16.msra.mxu2 %v3703_v31 }
 0x4b9   : > { %v1336_v50 = vpop.f32.mrf.mxu1 }
 0x4ba   : > { %v3704_v50 = vld [vmem:[%s4882_s21 + $0x40] sm:$0xf0] }
 0x4bb   : > { %v3707_v33 = vor.u32 %v4411_v29, %v3704_v50  ;;  %v3806_v29 = vld [vmem:[%s4882_s21 + $0xa8] sm:$0xf] }
 0x4bc   : > { %v4440_v50 = vld [vmem:[%s4882_s21 + $0xe4] sm:$0xf0] }
 0x4bd   : > { %1789 = vmatpush.bf16.msra.mxu3 %v3707_v33 }
 0x4d9   : > { %v4615_v35 = vpop.permute.xlu2 %4614 }
 0x4da   : > { %v4617_v38 = vunpack.i.h.bf16 %v4615_v35  ;;  %v4616_v40 = vunpack.i.l.bf16 %v4615_v35  ;;  %v4412_v35 = vld [vmem:[%s4882_s21 + $0xc] sm:$0xf] }
 0x4dc   : > { %v1415_v49 = vsel %vm1414_vm5, %v1413_v45, %v4616_v40  ;;  %v1431_v52 = vsel %vm1414_vm5, %v1430_v46, %v4617_v38  ;;  %v3711_v38 = vor.u32 %v4420_v34, %v3710_v32  ;;  %v3715_v40 = vor.u32 %v4412_v35, %v3712_v36  ;;  %v4437_v45 = vld [vmem:[%s4882_s21 + $0xcc] sm:$0xf0]  ;;  %v4429_v46 = vld [vmem:[%s4882_s21 + $0x94] sm:$0xf]  ;;  %v4432_v32 = vld [vmem:[%s4882_s21 + $0xac] sm:$0xf] }
 0x4dd   : > { %v3803_v35 = vor.u32 %v4431_v23, %v3800_v27  ;;  %v3734_v36 = vld [vmem:[%s4882_s21 + $0x20] sm:$0xf] }
 0x4de   : > { %1803 = vmatpush.bf16.msrb.mxu0 %v3711_v38  ;;  %1817 = vmatpush.bf16.msrb.mxu1 %v3715_v40  ;;  %v4423_v38 = vld [vmem:[%s4882_s21 + $0x5c] sm:$0xf0]  ;;  %v3807_v40 = vor.u32 %v4440_v50, %v3806_v29  ;;  %v4462_v29 = vld [vmem:[%s4897_s16 + $0x98] sm:$0xff] }
 0x4df   : > { %v4447_v23 = vld [vmem:[%s4897_s16 + $0x20] sm:$0xff]  ;;  %v4470_v50 = vld [vmem:[%s4897_s16 + $0xd8] sm:$0xff] }
 0x4e0   : > { %v4455_v27 = vld [vmem:[%s4897_s16 + $0x60] sm:$0xff] }
 0x50d   : > { %v4620_v43 = vpop.permute.xlu1 %4619 }
 0x50e   : > { %v4622_v47 = vunpack.i.h.bf16 %v4620_v43  ;;  %v4621_v48 = vunpack.i.l.bf16 %v4620_v43  ;;  %v3782_v43 = vld [vmem:[%s4882_s21 + $0x90] sm:$0xf] }
 0x510   : > { %v1417_v53 = vsel %vm1416_vm6, %v1415_v49, %v4621_v48  ;;  %v1432_v55 = vsel %vm1416_vm6, %v1431_v52, %v4622_v47  ;;  %v3783_v48 = vor.u32 %v4437_v45, %v3782_v43  ;;  %v3784_v49 = vld [vmem:[%s4882_s21 + $0xd0] sm:$0xf0]  ;;  %v3790_v52 = vld [vmem:[%s4882_s21 + $0x98] sm:$0xf]  ;;  %v4415_v43 = vld [vmem:[%s4882_s21 + $0x24] sm:$0xf] }
 0x511   : > { %v1433_v54 = vpack.c.bf16 %v1432_v55, %v1417_v53  ;;  %v4438_v53 = vld [vmem:[%s4882_s21 + $0xd4] sm:$0xf0]  ;;  %v3787_v55 = vor.u32 %v4429_v46, %v3784_v49  ;;  %v3736_v45 = vld [vmem:[%s4882_s21 + $0x60] sm:$0xf0]  ;;  %v3742_v46 = vld [vmem:[%s4882_s21 + $0x28] sm:$0xf] }
 0x512   : > { %1830 = vmatpush.bf16.msrb.mxu2 %v3783_v48  ;;  %v4416_v48 = vld [vmem:[%s4882_s21 + $0x2c] sm:$0xf] }
 0x513   : > { %3699 = vmatmul.msk.bf16.vlgmr.msra.gmra.mxu1 %vm867_vm2, %v1433_v54  ;;  %v3791_v54 = vor.u32 %v4438_v53, %v3790_v52  ;;  %1844 = vmatpush.bf16.msrb.mxu3 %v3787_v55  ;;  %v3744_v49 = vld [vmem:[%s4882_s21 + $0x68] sm:$0xf0]  ;;  %v3735_v52 = vor.u32 %v4423_v38, %v3734_v36  ;;  %v3739_v53 = vor.u32 %v4415_v43, %v3736_v45  ;;  %v4445_v36 = vld [vmem:[%s4897_s16 + $0x10] sm:$0xff]  ;;  %v4459_v45 = vld [vmem:[%s4897_s16 + $0x80] sm:$0xff] }
 0x514   : > { %v4453_v38 = vld [vmem:[%s4897_s16 + $0x50] sm:$0xff]  ;;  %v4452_v43 = vld [vmem:[%s4897_s16 + $0x48] sm:$0xff] }
 0x515   : > { %1858 = vmatpush.bf16.msra.mxu0 %v3791_v54  ;;  %v3747_v54 = vor.u32 %v4416_v48, %v3744_v49  ;;  %v4506_v48 = vld [vmem:[%s4897_s16 + $0x1f8] sm:$0xff]  ;;  %v4443_v49 = vld [vmem:[%s4897_s16] sm:$0xff] }
 0x590   : > { %v1466_v57 = vpop.f32.mrf.mxu1 }
 0x591   : > { %v1467_v58 = vadd.f32 %v4624_v56, %v1466_v57  ;;  %v3792_v57 = vld [vmem:[%s4882_s21 + $0xd8] sm:$0xf0] }
 0x593   : > { %v1471_v59 = vadd.f32 %v1467_v58, %v4920_v15  ;;  %v5112_v15 = vsel %vm1486_vm7, %v4663_v0, %v1485_v3  ;;  %v3718_v58 = vld [vmem:[%s4882_s21 + $0x10] sm:$0xf]  ;;  %v3720_v0 = vld [vmem:[%s4882_s21 + $0x50] sm:$0xf0]  ;;  %v3727_v3 = vor.u32 %v4422_v1, %v3726_v42 }
 0x594   : > { %v4425_v42 = vld [vmem:[%s4882_s21 + $0x6c] sm:$0xf0] }
 0x595   : > { %v1475_v60 = vsel %vm867_vm2, %v1471_v59, 0.0  ;;  %1859 = vmatpush.bf16.msra.mxu0 %v3727_v3  ;;  %v4417_v3 = vld [vmem:[%s4882_s21 + $0x34] sm:$0xf] }
 0x596   : > { %1476 = vadd.xlane.f32.xlu0 %v1475_v60 }
 0x598   : > { %v1468_v61 = vpop.f32.mrf.mxu1 }
 0x599   : > { %v1469_v62 = vadd.f32 %v4624_v56, %v1468_v61  ;;  %v4430_v56 = vld [vmem:[%s4882_s21 + $0x9c] sm:$0xf] }
 0x59a   : > { %v3795_v61 = vor.u32 %v4430_v56, %v3792_v57  ;;  %v3814_v56 = vld [vmem:[%s4882_s21 + $0xb0] sm:$0xf] }
 0x59b   : > { %v1472_v44 = vadd.f32 %v1469_v62, %v4922_v16  ;;  %v4421_v62 = vld [vmem:[%s4882_s21 + $0x4c] sm:$0xf0] }
 0x59c   : > { %v3719_v37 = vor.u32 %v4421_v62, %v3718_v58  ;;  %1872 = vmatpush.bf16.msra.mxu1 %v3795_v61  ;;  %v4441_v57 = vld [vmem:[%s4882_s21 + $0xec] sm:$0xf0]  ;;  %v4433_v58 = vld [vmem:[%s4882_s21 + $0xb4] sm:$0xf]  ;;  %v4442_v61 = vld [vmem:[%s4882_s21 + $0xf4] sm:$0xf0] }
 0x59d   : > { %v1478_v63 = vsel %vm867_vm2, %v1472_v44, 0.0  ;;  %v4434_v62 = vld [vmem:[%s4882_s21 + $0xbc] sm:$0xf] }
 0x59e   : > { %1479 = vadd.xlane.f32.xlu2 %v1478_v63  ;;  %1831 = vmatpush.bf16.msrb.mxu2 %v3719_v37 }
 0x609   : > { %v1477_v4 = vpop.xlane.xlu0 %1476 }
 0x60a   : > { %v1488_v16 = vmul.f32 %v5112_v15, %v1477_v4  ;;  %v4414_v4 = vld [vmem:[%s4882_s21 + $0x1c] sm:$0xf] }
 0x60c   : > { %v5115_v5 = vsub.f32 %v1471_v59, %v1488_v16  ;;  %v3728_v16 = vld [vmem:[%s4882_s21 + $0x58] sm:$0xf0] }
 0x60e   : > { %v1492_v6 = vmul.f32 %v5115_v5, %v5115_v5 }
 0x610   : > { %v1494_v7 = vsel %vm867_vm2, %v1492_v6, 0.0 }
 0x611   : > { %v1480_v8 = vpop.xlane.xlu2 %1479  ;;  %1495 = vadd.xlane.f32.xlu1 %v1494_v7  ;;  %v3731_v7 = vor.u32 %v4414_v4, %v3728_v16  ;;  %v3752_v4 = vld [vmem:[%s4882_s21 + $0x70] sm:$0xf0]  ;;  %v3758_v16 = vld [vmem:[%s4882_s21 + $0x38] sm:$0xf] }
 0x612   : > { %v1489_v9 = vmul.f32 %v5112_v15, %v1480_v8 }
 0x613   : > { %1873 = vmatpush.bf16.msra.mxu1 %v3731_v7  ;;  %v4418_v7 = vld [vmem:[%s4882_s21 + $0x3c] sm:$0xf] }
 0x614   : > { %v5121_v10 = vsub.f32 %v1472_v44, %v1489_v9  ;;  %v4413_v44 = vld [vmem:[%s4882_s21 + $0x14] sm:$0xf] }
 0x615   : > { %v3723_v2 = vor.u32 %v4413_v44, %v3720_v0  ;;  %v3824_v44 = vld [vmem:[%s4882_s21 + $0xf8] sm:$0xf0]  ;;  %v3750_v0 = vld [vmem:[%s4882_s21 + $0x30] sm:$0xf] }
 0x616   : > { %v1493_v11 = vmul.f32 %v5121_v10, %v5121_v10 }
 0x617   : > { %1845 = vmatpush.bf16.msrb.mxu3 %v3723_v2  ;;  %v3827_v2 = vor.u32 %v4434_v62, %v3824_v44  ;;  %v4503_v62 = vld [vmem:[%s4897_s16 + $0x1e0] sm:$0xff]  ;;  %v4480_v44 = vld [vmem:[%s4897_s16 + $0x128] sm:$0xff] }
 0x618   : > { %v1497_v12 = vsel %vm867_vm2, %v1493_v11, 0.0 }
 0x619   : > { %1498 = vadd.xlane.f32.xlu0 %v1497_v12 }
 0x684   : > { %v1496_v20 = vpop.xlane.xlu1 %1495 }
 0x685   : > { %v1500_v25 = vmul.f32 %v1496_v20, %v5112_v15 }
 0x687   : > { %v5138_v30 = vadd.f32 1e-05, %v1500_v25 }
 0x689   : > { %4664 = vrsqrt.f32 %v5138_v30  ;;  %vm1510_vm9 = vweird.f32 %v5138_v30 }
 0x68c   : > { %v1499_v41 = vpop.xlane.xlu0 %1498 }
 0x68d   : > { %v1501_v47 = vmul.f32 %v1499_v41, %v5112_v15 }
 0x68f   : > { %v4665_v59 = vpop.eup %4664  ;;  %v1503_v60 = vadd.f32 1e-05, %v1501_v47  ;;  %v4424_v47 = vld [vmem:[%s4882_s21 + $0x64] sm:$0xf0] }
 0x690   : > { %v1505_v63 = vmul.f32 %v4665_v59, %v5138_v30  ;;  %vm1511_vm8 = vweird.f32 %v4665_v59  ;;  %v3743_v55 = vor.u32 %v4424_v47, %v3742_v46  ;;  %v4467_v46 = vld [vmem:[%s4897_s16 + $0xc0] sm:$0xff]  ;;  %v4498_v47 = vld [vmem:[%s4897_s16 + $0x1b8] sm:$0xff] }
 0x691   : > { %4666 = vrsqrt.f32 %v1503_v60  ;;  %vm1512_vm10 = vmor %vm1510_vm9, %vm1511_vm8  ;;  %vm1520_vm12 = vweird.f32 %v1503_v60 }
 0x692   : > { %v1506_v6 = vmul.f32 %v4665_v59, %v1505_v63  ;;  %v3815_v63 = vor.u32 %v4441_v57, %v3814_v56  ;;  %v4505_v56 = vld [vmem:[%s4897_s16 + $0x1f0] sm:$0xff] }
 0x693   : > { %v4481_v57 = vld [vmem:[%s4897_s16 + $0x130] sm:$0xff] }
 0x694   : > { %v1507_v8 = vmul.f32 0.5, %v1506_v6  ;;  %v4426_v6 = vld [vmem:[%s4882_s21 + $0x74] sm:$0xf0] }
 0x696   : > { %v1508_v9 = vsub.f32 1.5, %v1507_v8  ;;  %v3760_v8 = vld [vmem:[%s4882_s21 + $0x78] sm:$0xf0] }
 0x697   : > { %v4667_v11 = vpop.eup %4666 }
 0x698   : > { %v1509_v12 = vmul.f32 %v4665_v59, %v1508_v9  ;;  %v1515_v13 = vmul.f32 %v4667_v11, %v1503_v60  ;;  %vm1521_vm11 = vweird.f32 %v4667_v11  ;;  %v3822_v60 = vld [vmem:[%s4882_s21 + $0xb8] sm:$0xf]  ;;  %v3751_v9 = vor.u32 %v4425_v42, %v3750_v0  ;;  %v4479_v42 = vld [vmem:[%s4897_s16 + $0x120] sm:$0xff] }
 0x699   : > { %vm1522_vm13 = vmor %vm1520_vm12, %vm1521_vm11  ;;  %v3823_v1 = vor.u32 %v4442_v61, %v3822_v60  ;;  %v4504_v60 = vld [vmem:[%s4897_s16 + $0x1e8] sm:$0xff]  ;;  %v4495_v61 = vld [vmem:[%s4897_s16 + $0x1a0] sm:$0xff] }
 0x69a   : > { %v1516_v14 = vmul.f32 %v4667_v11, %v1515_v13  ;;  %v1513_v28 = vsel %vm1512_vm10, %v4665_v59, %v1509_v12  ;;  %v3816_v59 = vld [vmem:[%s4882_s21 + $0xf0] sm:$0xf0]  ;;  %v3759_v12 = vor.u32 %v4426_v6, %v3758_v16  ;;  %v3763_v13 = vor.u32 %v4418_v7, %v3760_v8  ;;  %v4502_v0 = vld [vmem:[%s4897_s16 + $0x1d8] sm:$0xff]  ;;  %v4492_v6 = vld [vmem:[%s4897_s16 + $0x188] sm:$0xff] }
 0x69b   : > { %v1524_v19 = vmul.f32 %v1513_v28, %v5115_v5  ;;  %v4439_v5 = vld [vmem:[%s4882_s21 + $0xdc] sm:$0xf0]  ;;  %v3819_v37 = vor.u32 %v4433_v58, %v3816_v59  ;;  %v4474_v28 = vld [vmem:[%s4897_s16 + $0xf8] sm:$0xff]  ;;  %v4489_v58 = vld [vmem:[%s4897_s16 + $0x170] sm:$0xff] }
 0x69c   : > { %v1517_v17 = vmul.f32 0.5, %v1516_v14  ;;  %v3799_v34 = vor.u32 %v4439_v5, %v3798_v26  ;;  %v4466_v14 = vld [vmem:[%s4897_s16 + $0xb8] sm:$0xff]  ;;  %v4463_v26 = vld [vmem:[%s4897_s16 + $0xa0] sm:$0xff]  ;;  %v4496_v59 = vld [vmem:[%s4897_s16 + $0x1a8] sm:$0xff] }
 0x69d   : > { %v1529_v24 = vmul.f32 %v4625_v51, %v1524_v19  ;;  %v4473_v19 = vld [vmem:[%s4897_s16 + $0xf0] sm:$0xff]  ;;  %v4471_v5 = vld [vmem:[%s4897_s16 + $0xe0] sm:$0xff]  ;;  %v4486_v16 = vld [vmem:[%s4897_s16 + $0x158] sm:$0xff] }
 0x69e   : > { %v1518_v18 = vsub.f32 1.5, %v1517_v17  ;;  %v4450_v17 = vld [vmem:[%s4897_s16 + $0x38] sm:$0xff]  ;;  %v4500_v7 = vld [vmem:[%s4897_s16 + $0x1c8] sm:$0xff]  ;;  %v4477_v8 = vld [vmem:[%s4897_s16 + $0x110] sm:$0xff] }
 0x69f   : > { %v5182_v30 = vadd.f32 %v4626_v22, %v1529_v24  ;;  %v4472_v24 = vld [vmem:[%s4897_s16 + $0xe8] sm:$0xff] }
 0x6a0   : > { %v1519_v20 = vmul.f32 %v4667_v11, %v1518_v18  ;;  %v4458_v18 = vld [vmem:[%s4897_s16 + $0x78] sm:$0xff] }
 0x6a2   : > { %v1523_v21 = vsel %vm1522_vm13, %v4667_v11, %v1519_v20  ;;  %v3755_v11 = vor.u32 %v4417_v3, %v3752_v4  ;;  %v4449_v20 = vld [vmem:[%s4897_s16 + $0x30] sm:$0xff]  ;;  %v4478_v4 = vld [vmem:[%s4897_s16 + $0x118] sm:$0xff] }
 0x6a3   : > { %v1525_v39 = vmul.f32 %v1523_v21, %v5121_v10  ;;  %v3808_v10 = vld [vmem:[%s4882_s21 + $0xe8] sm:$0xf0]  ;;  %v4457_v21 = vld [vmem:[%s4897_s16 + $0x70] sm:$0xff]  ;;  %s5526_s21 = sld [smem:[#allocation17_spill]] (!%p4356_p5) }
 0x6a4   : > { %v3811_v41 = vor.u32 %v4432_v32, %v3808_v10  ;;  %v4446_v32 = vld [vmem:[%s4897_s16 + $0x18] sm:$0xff]  ;;  %v4501_v3 = vld [vmem:[%s4897_s16 + $0x1d0] sm:$0xff] }
 0x6a5   : > { %v1530_v25 = vmul.f32 %v4625_v51, %v1525_v39  ;;  %v4465_v51 = vld [vmem:[%s4897_s16 + $0xb0] sm:$0xff]  ;;  %v4448_v39 = vld [vmem:[%s4897_s16 + $0x28] sm:$0xff]  ;;  %v4454_v10 = vld [vmem:[%s4897_s16 + $0x58] sm:$0xff] }
 0x6a7   : > { %v5184_v31 = vadd.f32 %v4626_v22, %v1530_v25  ;;  %v4464_v22 = vld [vmem:[%s4897_s16 + $0xa8] sm:$0xff] }
 0x6a8   : > { %v4456_v25 = vld [vmem:[%s4897_s16 + $0x68] sm:$0xff] }
 0x6a9   : > { %v5191_v33 = vpack.c.bf16 %v5184_v31, %v5182_v30 }
 0x6ab   : > { %3828 = vmatmul.msk.bf16.vlgmr.msra.gmra.mxu2 %vm867_vm2, %v5191_v33  ;;  %3829 = vmatmul.msk.bf16.vlgmr.msra.gmra.mxu3 %vm867_vm2, %v5191_v33 }
 0x6ac   : > { %3830 = vmatmul.msk.bf16.vlgmr.msrb.gmra.mxu0 %vm867_vm2, %v5191_v33  ;;  %3831 = vmatmul.msk.bf16.vlgmr.msrb.gmra.mxu1 %vm867_vm2, %v5191_v33 }
 0x6ad   : > { %1886 = vmatpush.bf16.msra.mxu2 %v3799_v34  ;;  %1900 = vmatpush.bf16.msra.mxu3 %v3803_v35  ;;  %v4461_v34 = vld [vmem:[%s4897_s16 + $0x90] sm:$0xff] }
 0x6ae   : > { %1914 = vmatpush.bf16.msrb.mxu0 %v3807_v40  ;;  %1928 = vmatpush.bf16.msrb.mxu1 %v3811_v41  ;;  %v4469_v35 = vld [vmem:[%s4897_s16 + $0xd0] sm:$0xff]  ;;  %v4460_v40 = vld [vmem:[%s4897_s16 + $0x88] sm:$0xff] }
 0x6af   : > { %v4444_v41 = vld [vmem:[%s4897_s16 + $0x8] sm:$0xff] }
 0x6b1   : > { %1887 = vmatpush.bf16.msra.mxu2 %v3735_v52  ;;  %1901 = vmatpush.bf16.msra.mxu3 %v3739_v53  ;;  %v4451_v52 = vld [vmem:[%s4897_s16 + $0x40] sm:$0xff]  ;;  %v4482_v53 = vld [vmem:[%s4897_s16 + $0x138] sm:$0xff] }
 0x6b2   : > { %1915 = vmatpush.bf16.msrb.mxu0 %v3743_v55  ;;  %1929 = vmatpush.bf16.msrb.mxu1 %v3747_v54  ;;  %v4490_v55 = vld [vmem:[%s4897_s16 + $0x178] sm:$0xff]  ;;  %v4497_v54 = vld [vmem:[%s4897_s16 + $0x1b0] sm:$0xff] }
 0x6bb   : > { %3832 = vmatmul.msk.bf16.vlgmr.msrb.gmra.mxu2 %vm867_vm2, %v5191_v33  ;;  %3833 = vmatmul.msk.bf16.vlgmr.msrb.gmra.mxu3 %vm867_vm2, %v5191_v33 }
 0x6bc   : > { %3834 = vmatmul.msk.bf16.vlgmr.msra.gmra.mxu0 %vm867_vm2, %v5191_v33  ;;  %3835 = vmatmul.msk.bf16.vlgmr.msra.gmra.mxu1 %vm867_vm2, %v5191_v33 }
 0x6bd   : > { %1942 = vmatpush.bf16.msrb.mxu2 %v3815_v63  ;;  %1956 = vmatpush.bf16.msrb.mxu3 %v3819_v37  ;;  %v4488_v63 = vld [vmem:[%s4897_s16 + $0x168] sm:$0xff]  ;;  %v4494_v37 = vld [vmem:[%s4897_s16 + $0x198] sm:$0xff] }
 0x6be   : > { %1970 = vmatpush.bf16.msra.mxu0 %v3823_v1  ;;  %1984 = vmatpush.bf16.msra.mxu1 %v3827_v2  ;;  %v4487_v1 = vld [vmem:[%s4897_s16 + $0x160] sm:$0xff]  ;;  %v4493_v2 = vld [vmem:[%s4897_s16 + $0x190] sm:$0xff] }
 0x6c1   : > { %1943 = vmatpush.bf16.msrb.mxu2 %v3751_v9  ;;  %1957 = vmatpush.bf16.msrb.mxu3 %v3755_v11  ;;  %v4485_v9 = vld [vmem:[%s4897_s16 + $0x150] sm:$0xff]  ;;  %v4491_v11 = vld [vmem:[%s4897_s16 + $0x180] sm:$0xff] }
 0x6c2   : > { %1971 = vmatpush.bf16.msra.mxu0 %v3759_v12  ;;  %1985 = vmatpush.bf16.msra.mxu1 %v3763_v13  ;;  %v4499_v12 = vld [vmem:[%s4897_s16 + $0x1c0] sm:$0xff]  ;;  %v4476_v13 = vld [vmem:[%s4897_s16 + $0x108] sm:$0xff] }
 0x6cb   : > { %3836 = vmatmul.msk.bf16.vlgmr.msra.gmra.mxu2 %vm867_vm2, %v5191_v33  ;;  %3837 = vmatmul.msk.bf16.vlgmr.msra.gmra.mxu3 %vm867_vm2, %v5191_v33 }
 0x6cc   : > { %3838 = vmatmul.msk.bf16.vlgmr.msrb.gmra.mxu0 %vm867_vm2, %v5191_v33  ;;  %3839 = vmatmul.msk.bf16.vlgmr.msrb.gmra.mxu1 %vm867_vm2, %v5191_v33 }
 0x6cd   : > { %3096 = vmatpush.bf16.msrb.mxu0 %v4466_v14  ;;  %3110 = vmatpush.bf16.msrb.mxu1 %v4474_v28  ;;  %v4484_v14 = vld [vmem:[%s4897_s16 + $0x148] sm:$0xff]  ;;  %v4475_v28 = vld [vmem:[%s4897_s16 + $0x100] sm:$0xff] }
 0x6ce   : > { %3068 = vmatpush.bf16.msra.mxu2 %v4450_v17  ;;  %3082 = vmatpush.bf16.msra.mxu3 %v4458_v18  ;;  %v4483_v17 = vld [vmem:[%s4897_s16 + $0x140] sm:$0xff] }
 0x6cf   : > { %v5314_v18 = vld [vmem:[%s4887_s18] sm:$0xff] }
 0x6d1   : > { %3097 = vmatpush.bf16.msrb.mxu0 %v4465_v51  ;;  %3111 = vmatpush.bf16.msrb.mxu1 %v4473_v19 }
 0x6d2   : > { %3069 = vmatpush.bf16.msra.mxu2 %v4449_v20  ;;  %3083 = vmatpush.bf16.msra.mxu3 %v4457_v21  ;;  %v1575_v20 = vperm.slane %v5314_v18, 2  ;;  %v1576_v21 = vperm.slane %v5314_v18, 3 }
 0x6d5   : > { %3098 = vmatpush.bf16.msrb.mxu0 %v4464_v22  ;;  %3112 = vmatpush.bf16.msrb.mxu1 %v4472_v24 }
 0x6d6   : > { %3070 = vmatpush.bf16.msra.mxu2 %v4448_v39  ;;  %3084 = vmatpush.bf16.msra.mxu3 %v4456_v25 }
 0x6d9   : > { %3099 = vmatpush.bf16.msrb.mxu0 %v4463_v26  ;;  %3113 = vmatpush.bf16.msrb.mxu1 %v4471_v5  ;;  %v1573_v26 = vperm.slane %v5314_v18, 0  ;;  %v1574_v5 = vperm.slane %v5314_v18, 1 }
 0x6da   : > { %3071 = vmatpush.bf16.msra.mxu2 %v4447_v23  ;;  %3085 = vmatpush.bf16.msra.mxu3 %v4455_v27 }
 0x6db   : > { %3840 = vmatmul.msk.bf16.vlgmr.msrb.gmra.mxu2 %vm867_vm2, %v5191_v33  ;;  %3841 = vmatmul.msk.bf16.vlgmr.msrb.gmra.mxu3 %vm867_vm2, %v5191_v33 }
 0x6dc   : > { %3842 = vmatmul.msk.bf16.vlgmr.msra.gmra.mxu0 %vm867_vm2, %v5191_v33  ;;  %3843 = vmatmul.msk.bf16.vlgmr.msra.gmra.mxu1 %vm867_vm2, %v5191_v33  ;;  %v4468_v33 = vld [vmem:[%s4897_s16 + $0xc8] sm:$0xff] }
 0x6dd   : > { %3100 = vmatpush.bf16.msrb.mxu0 %v4462_v29  ;;  %3114 = vmatpush.bf16.msrb.mxu1 %v4470_v50 }
 0x6de   : > { %3072 = vmatpush.bf16.msra.mxu2 %v4446_v32  ;;  %3086 = vmatpush.bf16.msra.mxu3 %v4454_v10 }
 0x6e1   : > { %3101 = vmatpush.bf16.msrb.mxu0 %v4461_v34  ;;  %3115 = vmatpush.bf16.msrb.mxu1 %v4469_v35 }
 0x6e2   : > { %3073 = vmatpush.bf16.msra.mxu2 %v4445_v36  ;;  %3087 = vmatpush.bf16.msra.mxu3 %v4453_v38 }
 0x6e5   : > { %3102 = vmatpush.bf16.msrb.mxu0 %v4460_v40  ;;  %3116 = vmatpush.bf16.msrb.mxu1 %v4468_v33  ;;  %v4530_v40 = vld [vmem:[%s4897_s16 + $0x2b8] sm:$0xff] }
 0x6e6   : > { %3074 = vmatpush.bf16.msra.mxu2 %v4444_v41  ;;  %3088 = vmatpush.bf16.msra.mxu3 %v4452_v43  ;;  %v4538_v33 = vld [vmem:[%s4897_s16 + $0x2f8] sm:$0xff] }
 0x6e9   : > { %3103 = vmatpush.bf16.msrb.mxu0 %v4459_v45  ;;  %3117 = vmatpush.bf16.msrb.mxu1 %v4467_v46 }
 0x6ea   : > { %3075 = vmatpush.bf16.msra.mxu2 %v4443_v49  ;;  %3089 = vmatpush.bf16.msra.mxu3 %v4451_v52 }
 0x6ed   : > { %3152 = vmatpush.bf16.msra.mxu0 %v4498_v47  ;;  %3166 = vmatpush.bf16.msra.mxu1 %v4506_v48 }
 0x6ee   : > { %3124 = vmatpush.bf16.msrb.mxu2 %v4482_v53  ;;  %3138 = vmatpush.bf16.msrb.mxu3 %v4490_v55 }
 0x6f1   : > { %3153 = vmatpush.bf16.msra.mxu0 %v4497_v54  ;;  %3167 = vmatpush.bf16.msra.mxu1 %v4505_v56 }
 0x6f2   : > { %3125 = vmatpush.bf16.msrb.mxu2 %v4481_v57  ;;  %3139 = vmatpush.bf16.msrb.mxu3 %v4489_v58  ;;  %v4529_v57 = vld [vmem:[%s4897_s16 + $0x2b0] sm:$0xff] }
 0x6f3   : > { %v4537_v58 = vld [vmem:[%s4897_s16 + $0x2f0] sm:$0xff] }
 0x6f5   : > { %3154 = vmatpush.bf16.msra.mxu0 %v4496_v59  ;;  %3168 = vmatpush.bf16.msra.mxu1 %v4504_v60 }
 0x6f6   : > { %3126 = vmatpush.bf16.msrb.mxu2 %v4480_v44  ;;  %3140 = vmatpush.bf16.msrb.mxu3 %v4488_v63  ;;  %v1579_v44 = vperm.slane %v5314_v18, 6  ;;  %v1580_v63 = vperm.slane %v5314_v18, 7 }
 0x6f9   : > { %3155 = vmatpush.bf16.msra.mxu0 %v4495_v61  ;;  %3169 = vmatpush.bf16.msra.mxu1 %v4503_v62  ;;  %v4514_v61 = vld [vmem:[%s4897_s16 + $0x238] sm:$0xff] }
 0x6fa   : > { %3127 = vmatpush.bf16.msrb.mxu2 %v4479_v42  ;;  %3141 = vmatpush.bf16.msrb.mxu3 %v4487_v1  ;;  %v4522_v62 = vld [vmem:[%s4897_s16 + $0x278] sm:$0xff] }
 0x6fd   : > { %3156 = vmatpush.bf16.msra.mxu0 %v4494_v37  ;;  %3170 = vmatpush.bf16.msra.mxu1 %v4502_v0  ;;  %v4528_v37 = vld [vmem:[%s4897_s16 + $0x2a8] sm:$0xff] }
 0x6fe   : > { %3128 = vmatpush.bf16.msrb.mxu2 %v4478_v4  ;;  %3142 = vmatpush.bf16.msrb.mxu3 %v4486_v16  ;;  %v4536_v0 = vld [vmem:[%s4897_s16 + $0x2e8] sm:$0xff] }
 0x701   : > { %3157 = vmatpush.bf16.msra.mxu0 %v4493_v2  ;;  %3171 = vmatpush.bf16.msra.mxu1 %v4501_v3  ;;  %v4513_v2 = vld [vmem:[%s4897_s16 + $0x230] sm:$0xff] }
 0x702   : > { %3129 = vmatpush.bf16.msrb.mxu2 %v4477_v8  ;;  %3143 = vmatpush.bf16.msrb.mxu3 %v4485_v9  ;;  %v4521_v3 = vld [vmem:[%s4897_s16 + $0x270] sm:$0xff] }
 0x705   : > { %3158 = vmatpush.bf16.msra.mxu0 %v4492_v6  ;;  %3172 = vmatpush.bf16.msra.mxu1 %v4500_v7  ;;  %v1577_v6 = vperm.slane %v5314_v18, 4  ;;  %v1578_v7 = vperm.slane %v5314_v18, 5 }
 0x706   : > { %3130 = vmatpush.bf16.msrb.mxu2 %v4476_v13  ;;  %3144 = vmatpush.bf16.msrb.mxu3 %v4484_v14 }
 0x709   : > { %3159 = vmatpush.bf16.msra.mxu0 %v4491_v11  ;;  %3173 = vmatpush.bf16.msra.mxu1 %v4499_v12  ;;  %v4527_v11 = vld [vmem:[%s4897_s16 + $0x2a0] sm:$0xff] }
 0x70a   : > { %3131 = vmatpush.bf16.msrb.mxu2 %v4475_v28  ;;  %3145 = vmatpush.bf16.msrb.mxu3 %v4483_v17  ;;  %v4535_v12 = vld [vmem:[%s4897_s16 + $0x2e0] sm:$0xff]  ;;  %v4512_v28 = vld [vmem:[%s4897_s16 + $0x228] sm:$0xff] }
 0x70b   : > { %v4520_v17 = vld [vmem:[%s4897_s16 + $0x268] sm:$0xff] }
 0x729   : > { %v1805_v51 = vpop.f32.mrf.mxu0  ;;  %v1819_v19 = vpop.f32.mrf.mxu1 }
 0x72a   : > { %v1806_v39 = vadd.f32 %v1805_v51, %v1575_v20  ;;  %v1820_v25 = vadd.f32 %v1819_v19, %v1576_v21 }
 0x72c   : > { %v1994_v32 = vmax.f32 %v1806_v39, 0.0  ;;  %v1995_v10 = vmax.f32 %v1820_v25, 0.0  ;;  %v4534_v39 = vld [vmem:[%s4897_s16 + $0x2d8] sm:$0xff] }
 0x72e   : > { %v1777_v22 = vpop.f32.mrf.mxu2  ;;  %v1791_v24 = vpop.f32.mrf.mxu3 }
 0x72f   : > { %v1778_v36 = vadd.f32 %v1777_v22, %v1573_v26  ;;  %v1792_v38 = vadd.f32 %v1791_v24, %v1574_v5  ;;  %v4526_v24 = vld [vmem:[%s4897_s16 + $0x298] sm:$0xff] }
 0x731   : > { %v1807_v23 = vpop.f32.mrf.mxu0  ;;  %v1821_v27 = vpop.f32.mrf.mxu1  ;;  %v1992_v49 = vmax.f32 %v1778_v36, 0.0  ;;  %v1993_v52 = vmax.f32 %v1792_v38, 0.0 }
 0x732   : > { %v1808_v29 = vadd.f32 %v1807_v23, %v1575_v20  ;;  %v1822_v50 = vadd.f32 %v1821_v27, %v1576_v21 }
 0x734   : > { %v2010_v34 = vmax.f32 %v1808_v29, 0.0  ;;  %v2011_v35 = vmax.f32 %v1822_v50, 0.0  ;;  %v4511_v50 = vld [vmem:[%s4897_s16 + $0x220] sm:$0xff] }
 0x736   : > { %v2026_v41 = vpack.c.bf16 %v2010_v34, %v1994_v32  ;;  %v2027_v43 = vpack.c.bf16 %v2011_v35, %v1995_v10  ;;  %v1779_v45 = vpop.f32.mrf.mxu2  ;;  %v1793_v46 = vpop.f32.mrf.mxu3  ;;  %v4519_v32 = vld [vmem:[%s4897_s16 + $0x260] sm:$0xff]  ;;  %v5343_v10 = vld [vmem:[%s4887_s18 + $0x8] sm:$0xff] }
 0x737   : > { %v1780_v47 = vadd.f32 %v1779_v45, %v1573_v26  ;;  %v1794_v48 = vadd.f32 %v1793_v46, %v1574_v5 }
 0x738   : > { %3104 = vmatmul.bf16.vlgmr.msrb.gmra.mxu0 %v2026_v41  ;;  %3118 = vmatmul.bf16.vlgmr.msrb.gmra.mxu1 %v2027_v43  ;;  %v4525_v41 = vld [vmem:[%s4897_s16 + $0x290] sm:$0xff] }
 0x739   : > { %v2008_v53 = vmax.f32 %v1780_v47, 0.0  ;;  %v2009_v55 = vmax.f32 %v1794_v48, 0.0  ;;  %3208 = vmatpush.bf16.msrb.mxu0 %v4530_v40  ;;  %3222 = vmatpush.bf16.msrb.mxu1 %v4538_v33  ;;  %v1861_v54 = vpop.f32.mrf.mxu0  ;;  %v1875_v56 = vpop.f32.mrf.mxu1  ;;  %v4533_v43 = vld [vmem:[%s4897_s16 + $0x2d0] sm:$0xff]  ;;  %v4510_v47 = vld [vmem:[%s4897_s16 + $0x218] sm:$0xff] }
 0x73a   : > { %v1862_v4 = vadd.f32 %v1861_v54, %v1579_v44  ;;  %v1876_v16 = vadd.f32 %v1875_v56, %v1580_v63  ;;  %v4518_v48 = vld [vmem:[%s4897_s16 + $0x258] sm:$0xff] }
 0x73b   : > { %v2024_v59 = vpack.c.bf16 %v2008_v53, %v1992_v49  ;;  %v2025_v60 = vpack.c.bf16 %v2009_v55, %v1993_v52  ;;  %v1583_v49 = vperm.slane %v5343_v10, 2  ;;  %v1584_v52 = vperm.slane %v5343_v10, 3  ;;  %v4524_v53 = vld [vmem:[%s4897_s16 + $0x288] sm:$0xff] }
 0x73c   : > { %v1998_v51 = vmax.f32 %v1862_v4, 0.0  ;;  %v1999_v19 = vmax.f32 %v1876_v16, 0.0  ;;  %v4532_v55 = vld [vmem:[%s4897_s16 + $0x2c8] sm:$0xff] }
 0x73d   : > { %3209 = vmatpush.bf16.msrb.mxu0 %v4529_v57  ;;  %3223 = vmatpush.bf16.msrb.mxu1 %v4537_v58  ;;  %v4509_v57 = vld [vmem:[%s4897_s16 + $0x210] sm:$0xff]  ;;  %v4508_v4 = vld [vmem:[%s4897_s16 + $0x208] sm:$0xff] }
 0x73e   : > { %3076 = vmatmul.bf16.vlgmr.msra.gmra.mxu2 %v2024_v59  ;;  %3090 = vmatmul.bf16.vlgmr.msra.gmra.mxu3 %v2025_v60  ;;  %v1833_v42 = vpop.f32.mrf.mxu2  ;;  %v1847_v1 = vpop.f32.mrf.mxu3  ;;  %v4517_v58 = vld [vmem:[%s4897_s16 + $0x250] sm:$0xff]  ;;  %v4516_v16 = vld [vmem:[%s4897_s16 + $0x248] sm:$0xff] }
 0x73f   : > { %3180 = vmatpush.bf16.msra.mxu2 %v4514_v61  ;;  %3194 = vmatpush.bf16.msra.mxu3 %v4522_v62  ;;  %v1834_v18 = vadd.f32 %v1833_v42, %v1577_v6  ;;  %v1848_v22 = vadd.f32 %v1847_v1, %v1578_v7  ;;  %v1581_v61 = vperm.slane %v5343_v10, 0  ;;  %v1582_v62 = vperm.slane %v5343_v10, 1 }
 0x741   : > { %3210 = vmatpush.bf16.msrb.mxu0 %v4528_v37  ;;  %3224 = vmatpush.bf16.msrb.mxu1 %v4536_v0  ;;  %v1863_v8 = vpop.f32.mrf.mxu0  ;;  %v1877_v9 = vpop.f32.mrf.mxu1  ;;  %v1996_v34 = vmax.f32 %v1834_v18, 0.0  ;;  %v1997_v35 = vmax.f32 %v1848_v22, 0.0  ;;  %v4523_v37 = vld [vmem:[%s4897_s16 + $0x280] sm:$0xff] }
 0x742   : > { %v1864_v13 = vadd.f32 %v1863_v8, %v1579_v44  ;;  %v1878_v14 = vadd.f32 %v1877_v9, %v1580_v63  ;;  %v4531_v0 = vld [vmem:[%s4897_s16 + $0x2c0] sm:$0xff] }
 0x743   : > { %3181 = vmatpush.bf16.msra.mxu2 %v4513_v2  ;;  %3195 = vmatpush.bf16.msra.mxu3 %v4521_v3  ;;  %v4562_v2 = vld [vmem:[%s4897_s16 + $0x3b8] sm:$0xff]  ;;  %v4507_v18 = vld [vmem:[%s4897_s16 + $0x200] sm:$0xff] }
 0x744   : > { %v2014_v20 = vmax.f32 %v1864_v13, 0.0  ;;  %v2015_v21 = vmax.f32 %v1878_v14, 0.0  ;;  %v4570_v3 = vld [vmem:[%s4897_s16 + $0x3f8] sm:$0xff]  ;;  %v4515_v22 = vld [vmem:[%s4897_s16 + $0x240] sm:$0xff] }
 0x745   : > { %3211 = vmatpush.bf16.msrb.mxu0 %v4527_v11  ;;  %3225 = vmatpush.bf16.msrb.mxu1 %v4535_v12 }
 0x746   : > { %v2030_v25 = vpack.c.bf16 %v2014_v20, %v1998_v51  ;;  %v2031_v26 = vpack.c.bf16 %v2015_v21, %v1999_v19  ;;  %v1835_v5 = vpop.f32.mrf.mxu2  ;;  %v1849_v23 = vpop.f32.mrf.mxu3  ;;  %v4561_v51 = vld [vmem:[%s4897_s16 + $0x3b0] sm:$0xff] }
 0x747   : > { %3182 = vmatpush.bf16.msra.mxu2 %v4512_v28  ;;  %3196 = vmatpush.bf16.msra.mxu3 %v4520_v17  ;;  %v1836_v27 = vadd.f32 %v1835_v5, %v1577_v6  ;;  %v1850_v29 = vadd.f32 %v1849_v23, %v1578_v7  ;;  %v4569_v19 = vld [vmem:[%s4897_s16 + $0x3f0] sm:$0xff] }
 0x748   : > { %3160 = vmatmul.bf16.vlgmr.msra.gmra.mxu0 %v2030_v25  ;;  %3174 = vmatmul.bf16.vlgmr.msra.gmra.mxu1 %v2031_v26 }
 0x749   : > { %v2012_v36 = vmax.f32 %v1836_v27, 0.0  ;;  %v2013_v38 = vmax.f32 %v1850_v29, 0.0  ;;  %3212 = vmatpush.bf16.msrb.mxu0 %v4526_v24  ;;  %3226 = vmatpush.bf16.msrb.mxu1 %v4534_v39  ;;  %v1917_v40 = vpop.f32.mrf.mxu0  ;;  %v1931_v33 = vpop.f32.mrf.mxu1  ;;  %v4546_v24 = vld [vmem:[%s4897_s16 + $0x338] sm:$0xff]  ;;  %v4560_v27 = vld [vmem:[%s4897_s16 + $0x3a8] sm:$0xff] }
 0x74a   : > { %v1918_v59 = vadd.f32 %v1917_v40, %v1583_v49  ;;  %v1932_v60 = vadd.f32 %v1931_v33, %v1584_v52  ;;  %v4554_v39 = vld [vmem:[%s4897_s16 + $0x378] sm:$0xff]  ;;  %v4568_v29 = vld [vmem:[%s4897_s16 + $0x3e8] sm:$0xff]  ;;  %v4559_v40 = vld [vmem:[%s4897_s16 + $0x3a0] sm:$0xff] }
 0x74b   : > { %v2028_v45 = vpack.c.bf16 %v2012_v36, %v1996_v34  ;;  %v2029_v46 = vpack.c.bf16 %v2013_v38, %v1997_v35  ;;  %3183 = vmatpush.bf16.msra.mxu2 %v4511_v50  ;;  %3197 = vmatpush.bf16.msra.mxu3 %v4519_v32  ;;  %v4545_v34 = vld [vmem:[%s4897_s16 + $0x330] sm:$0xff]  ;;  %v4567_v33 = vld [vmem:[%s4897_s16 + $0x3e0] sm:$0xff] }
 0x74c   : > { %v2002_v6 = vmax.f32 %v1918_v59, 0.0  ;;  %v2003_v7 = vmax.f32 %v1932_v60, 0.0  ;;  %v4553_v35 = vld [vmem:[%s4897_s16 + $0x370] sm:$0xff]  ;;  %v1587_v59 = vperm.slane %v5343_v10, 6  ;;  %v1588_v60 = vperm.slane %v5343_v10, 7 }
 0x74d   : > { %3213 = vmatpush.bf16.msrb.mxu0 %v4525_v41  ;;  %3227 = vmatpush.bf16.msrb.mxu1 %v4533_v43  ;;  %v4544_v41 = vld [vmem:[%s4897_s16 + $0x328] sm:$0xff] }
 0x74e   : > { %3132 = vmatmul.bf16.vlgmr.msrb.gmra.mxu2 %v2028_v45  ;;  %3146 = vmatmul.bf16.vlgmr.msrb.gmra.mxu3 %v2029_v46  ;;  %v1889_v54 = vpop.f32.mrf.mxu2  ;;  %v1903_v56 = vpop.f32.mrf.mxu3  ;;  %v4552_v43 = vld [vmem:[%s4897_s16 + $0x368] sm:$0xff]  ;;  %v4558_v45 = vld [vmem:[%s4897_s16 + $0x398] sm:$0xff] }
 0x74f   : > { %3184 = vmatpush.bf16.msra.mxu2 %v4510_v47  ;;  %3198 = vmatpush.bf16.msra.mxu3 %v4518_v48  ;;  %v1890_v11 = vadd.f32 %v1889_v54, %v1581_v61  ;;  %v1904_v12 = vadd.f32 %v1903_v56, %v1582_v62  ;;  %v4566_v46 = vld [vmem:[%s4897_s16 + $0x3d8] sm:$0xff] }
 0x751   : > { %3214 = vmatpush.bf16.msrb.mxu0 %v4524_v53  ;;  %3228 = vmatpush.bf16.msrb.mxu1 %v4532_v55  ;;  %v1919_v44 = vpop.f32.mrf.mxu0  ;;  %v1933_v63 = vpop.f32.mrf.mxu1  ;;  %v2000_v25 = vmax.f32 %v1890_v11, 0.0  ;;  %v2001_v26 = vmax.f32 %v1904_v12, 0.0  ;;  %v4557_v53 = vld [vmem:[%s4897_s16 + $0x390] sm:$0xff]  ;;  %v4540_v11 = vld [vmem:[%s4897_s16 + $0x308] sm:$0xff] }
 0x752   : > { %v1920_v42 = vadd.f32 %v1919_v44, %v1583_v49  ;;  %v1934_v1 = vadd.f32 %v1933_v63, %v1584_v52  ;;  %v4543_v49 = vld [vmem:[%s4897_s16 + $0x320] sm:$0xff]  ;;  %v4565_v55 = vld [vmem:[%s4897_s16 + $0x3d0] sm:$0xff]  ;;  %v4548_v12 = vld [vmem:[%s4897_s16 + $0x348] sm:$0xff] }
 0x753   : > { %3185 = vmatpush.bf16.msra.mxu2 %v4509_v57  ;;  %3199 = vmatpush.bf16.msra.mxu3 %v4517_v58  ;;  %v4551_v52 = vld [vmem:[%s4897_s16 + $0x360] sm:$0xff]  ;;  %v4542_v57 = vld [vmem:[%s4897_s16 + $0x318] sm:$0xff] }
 0x754   : > { %v2018_v8 = vmax.f32 %v1920_v42, 0.0  ;;  %v2019_v9 = vmax.f32 %v1934_v1, 0.0  ;;  %v4550_v58 = vld [vmem:[%s4897_s16 + $0x358] sm:$0xff] }
 0x755   : > { %3215 = vmatpush.bf16.msrb.mxu0 %v4523_v37  ;;  %3229 = vmatpush.bf16.msrb.mxu1 %v4531_v0  ;;  %v4541_v37 = vld [vmem:[%s4897_s16 + $0x310] sm:$0xff] }
 0x756   : > { %v2034_v13 = vpack.c.bf16 %v2018_v8, %v2002_v6  ;;  %v2035_v14 = vpack.c.bf16 %v2019_v9, %v2003_v7  ;;  %v1891_v28 = vpop.f32.mrf.mxu2  ;;  %v1905_v17 = vpop.f32.mrf.mxu3  ;;  %v4549_v0 = vld [vmem:[%s4897_s16 + $0x350] sm:$0xff]  ;;  %v1585_v6 = vperm.slane %v5343_v10, 4  ;;  %v1586_v7 = vperm.slane %v5343_v10, 5  ;;  %v4539_v10 = vld [vmem:[%s4897_s16 + $0x300] sm:$0xff] }
 0x757   : > { %3186 = vmatpush.bf16.msra.mxu2 %v4508_v4  ;;  %3200 = vmatpush.bf16.msra.mxu3 %v4516_v16  ;;  %v1892_v20 = vadd.f32 %v1891_v28, %v1581_v61  ;;  %v1906_v21 = vadd.f32 %v1905_v17, %v1582_v62  ;;  %v4556_v61 = vld [vmem:[%s4897_s16 + $0x388] sm:$0xff]  ;;  %v4555_v4 = vld [vmem:[%s4897_s16 + $0x380] sm:$0xff] }
 0x758   : > { %3216 = vmatmul.bf16.vlgmr.msrb.gmra.mxu0 %v2034_v13  ;;  %3230 = vmatmul.bf16.vlgmr.msrb.gmra.mxu1 %v2035_v14  ;;  %v4564_v62 = vld [vmem:[%s4897_s16 + $0x3c8] sm:$0xff]  ;;  %v4563_v16 = vld [vmem:[%s4897_s16 + $0x3c0] sm:$0xff] }
 0x759   : > { %3264 = vmatpush.bf16.msra.mxu0 %v4562_v2  ;;  %3278 = vmatpush.bf16.msra.mxu1 %v4570_v3  ;;  %v2016_v5 = vmax.f32 %v1892_v20, 0.0  ;;  %v2017_v23 = vmax.f32 %v1906_v21, 0.0  ;;  %v1973_v36 = vpop.f32.mrf.mxu0  ;;  %v1987_v38 = vpop.f32.mrf.mxu1 }
 0x75a   : > { %v1974_v42 = vadd.f32 %v1973_v36, %v1587_v59  ;;  %v1988_v1 = vadd.f32 %v1987_v38, %v1588_v60  ;;  %v4627_v36 = vld [vmem:[%s790_s26] ss:$0 sm:$0xff] }
 0x75b   : > { %v2032_v50 = vpack.c.bf16 %v2016_v5, %v2000_v25  ;;  %v2033_v32 = vpack.c.bf16 %v2017_v23, %v2001_v26  ;;  %3187 = vmatpush.bf16.msra.mxu2 %v4507_v18  ;;  %3201 = vmatpush.bf16.msra.mxu3 %v4515_v22  ;;  %v4547_v18 = vld [vmem:[%s4897_s16 + $0x340] sm:$0xff] }
 0x75c   : > { %v2006_v13 = vmax.f32 %v1974_v42, 0.0  ;;  %v2007_v14 = vmax.f32 %v1988_v1, 0.0 }
 0x75d   : > { %3265 = vmatpush.bf16.msra.mxu0 %v4561_v51  ;;  %3279 = vmatpush.bf16.msra.mxu1 %v4569_v19 }
 0x75e   : > { %3188 = vmatmul.bf16.vlgmr.msra.gmra.mxu2 %v2032_v50  ;;  %3202 = vmatmul.bf16.vlgmr.msra.gmra.mxu3 %v2033_v32  ;;  %v1945_v47 = vpop.f32.mrf.mxu2  ;;  %v1959_v48 = vpop.f32.mrf.mxu3 }
 0x75f   : > { %3236 = vmatpush.bf16.msrb.mxu2 %v4546_v24  ;;  %3250 = vmatpush.bf16.msrb.mxu3 %v4554_v39  ;;  %v1946_v51 = vadd.f32 %v1945_v47, %v1585_v6  ;;  %v1960_v19 = vadd.f32 %v1959_v48, %v1586_v7 }
 0x761   : > { %3266 = vmatpush.bf16.msra.mxu0 %v4560_v27  ;;  %3280 = vmatpush.bf16.msra.mxu1 %v4568_v29  ;;  %v1975_v54 = vpop.f32.mrf.mxu0  ;;  %v1989_v56 = vpop.f32.mrf.mxu1  ;;  %v2004_v39 = vmax.f32 %v1946_v51, 0.0  ;;  %v2005_v25 = vmax.f32 %v1960_v19, 0.0 }
 0x762   : > { %v1976_v44 = vadd.f32 %v1975_v54, %v1587_v59  ;;  %v1990_v63 = vadd.f32 %v1989_v56, %v1588_v60 }
 0x763   : > { %3237 = vmatpush.bf16.msrb.mxu2 %v4545_v34  ;;  %3251 = vmatpush.bf16.msrb.mxu3 %v4553_v35 }
 0x764   : > { %v2022_v8 = vmax.f32 %v1976_v44, 0.0  ;;  %v2023_v9 = vmax.f32 %v1990_v63, 0.0 }
 0x765   : > { %3267 = vmatpush.bf16.msra.mxu0 %v4559_v40  ;;  %3281 = vmatpush.bf16.msra.mxu1 %v4567_v33 }
 0x766   : > { %v1947_v2 = vpop.f32.mrf.mxu2  ;;  %v1961_v3 = vpop.f32.mrf.mxu3  ;;  %v2038_v20 = vpack.c.bf16 %v2022_v8, %v2006_v13  ;;  %v2039_v21 = vpack.c.bf16 %v2023_v9, %v2007_v14 }
 0x767   : > { %3238 = vmatpush.bf16.msrb.mxu2 %v4544_v41  ;;  %3252 = vmatpush.bf16.msrb.mxu3 %v4552_v43  ;;  %v1948_v28 = vadd.f32 %v1947_v2, %v1585_v6  ;;  %v1962_v17 = vadd.f32 %v1961_v3, %v1586_v7 }
 0x769   : > { %3268 = vmatpush.bf16.msra.mxu0 %v4558_v45  ;;  %3282 = vmatpush.bf16.msra.mxu1 %v4566_v46  ;;  %v2020_v22 = vmax.f32 %v1948_v28, 0.0  ;;  %v2021_v24 = vmax.f32 %v1962_v17, 0.0 }
 0x76b   : > { %3239 = vmatpush.bf16.msrb.mxu2 %v4543_v49  ;;  %3253 = vmatpush.bf16.msrb.mxu3 %v4551_v52  ;;  %v2036_v26 = vpack.c.bf16 %v2020_v22, %v2004_v39  ;;  %v2037_v5 = vpack.c.bf16 %v2021_v24, %v2005_v25 }
 0x76d   : > { %3269 = vmatpush.bf16.msra.mxu0 %v4557_v53  ;;  %3283 = vmatpush.bf16.msra.mxu1 %v4565_v55 }
 0x76f   : > { %3240 = vmatpush.bf16.msrb.mxu2 %v4542_v57  ;;  %3254 = vmatpush.bf16.msrb.mxu3 %v4550_v58 }
 0x771   : > { %3270 = vmatpush.bf16.msra.mxu0 %v4556_v61  ;;  %3284 = vmatpush.bf16.msra.mxu1 %v4564_v62 }
 0x773   : > { %3241 = vmatpush.bf16.msrb.mxu2 %v4541_v37  ;;  %3255 = vmatpush.bf16.msrb.mxu3 %v4549_v0 }
 0x775   : > { %3271 = vmatpush.bf16.msra.mxu0 %v4555_v4  ;;  %3285 = vmatpush.bf16.msra.mxu1 %v4563_v16 }
 0x777   : > { %3242 = vmatpush.bf16.msrb.mxu2 %v4540_v11  ;;  %3256 = vmatpush.bf16.msrb.mxu3 %v4548_v12 }
 0x778   : > { %3272 = vmatmul.bf16.vlgmr.msra.gmra.mxu0 %v2038_v20  ;;  %3286 = vmatmul.bf16.vlgmr.msra.gmra.mxu1 %v2039_v21 }
 0x77b   : > { %3243 = vmatpush.bf16.msrb.mxu2 %v4539_v10  ;;  %3257 = vmatpush.bf16.msrb.mxu3 %v4547_v18 }
 0x77e   : > { %3244 = vmatmul.bf16.vlgmr.msrb.gmra.mxu2 %v2036_v26  ;;  %3258 = vmatmul.bf16.vlgmr.msrb.gmra.mxu3 %v2037_v5 }
 0x7b5   : > { %v3105_v29 = vpop.f32.mrf.mxu0  ;;  %v3119_v50 = vpop.f32.mrf.mxu1 }
 0x7bd   : > { %v3107_v35 = vpop.f32.mrf.mxu0  ;;  %v3121_v38 = vpop.f32.mrf.mxu1 }
 0x7c1   : > { %v3077_v23 = vpop.f32.mrf.mxu2  ;;  %v3091_v27 = vpop.f32.mrf.mxu3 }
 0x7c2   : > { %v3078_v40 = vadd.f32 %v4627_v36, %v3077_v23 }
 0x7c4   : > { %v3092_v43 = vadd.f32 %v3091_v27, %v3078_v40 }
 0x7c5   : > { %v3161_v45 = vpop.f32.mrf.mxu0  ;;  %v3175_v46 = vpop.f32.mrf.mxu1 }
 0x7c6   : > { %v3106_v47 = vadd.f32 %v3105_v29, %v3092_v43 }
 0x7c8   : > { %v3120_v52 = vadd.f32 %v3119_v50, %v3106_v47 }
 0x7c9   : > { %v3079_v32 = vpop.f32.mrf.mxu2  ;;  %v3093_v34 = vpop.f32.mrf.mxu3 }
 0x7ca   : > { %v3080_v48 = vadd.f32 %v4627_v36, %v3079_v32 }
 0x7cc   : > { %v3094_v49 = vadd.f32 %v3093_v34, %v3080_v48 }
 0x7cd   : > { %v3163_v56 = vpop.f32.mrf.mxu0  ;;  %v3177_v58 = vpop.f32.mrf.mxu1 }
 0x7ce   : > { %v3108_v57 = vadd.f32 %v3107_v35, %v3094_v49 }
 0x7d0   : > { %v3122_v60 = vadd.f32 %v3121_v38, %v3108_v57 }
 0x7d1   : > { %v3133_v33 = vpop.f32.mrf.mxu2  ;;  %v3147_v41 = vpop.f32.mrf.mxu3 }
 0x7d2   : > { %v3134_v54 = vadd.f32 %v3133_v33, %v3120_v52 }
 0x7d4   : > { %v3148_v59 = vadd.f32 %v3147_v41, %v3134_v54 }
 0x7d5   : > { %v3217_v37 = vpop.f32.mrf.mxu0  ;;  %v3231_v1 = vpop.f32.mrf.mxu1 }
 0x7d6   : > { %v3162_v61 = vadd.f32 %v3161_v45, %v3148_v59 }
 0x7d8   : > { %v3176_v42 = vadd.f32 %v3175_v46, %v3162_v61 }
 0x7d9   : > { %v3135_v53 = vpop.f32.mrf.mxu2  ;;  %v3149_v55 = vpop.f32.mrf.mxu3 }
 0x7da   : > { %v3136_v62 = vadd.f32 %v3135_v53, %v3122_v60 }
 0x7dc   : > { %v3150_v0 = vadd.f32 %v3149_v55, %v3136_v62 }
 0x7dd   : > { %v3219_v8 = vpop.f32.mrf.mxu0  ;;  %v3233_v12 = vpop.f32.mrf.mxu1 }
 0x7de   : > { %v3164_v3 = vadd.f32 %v3163_v56, %v3150_v0  ;;  %v4629_v0 = vld [vmem:[%s5522_s0] ss:$0 sm:$0xff] }
 0x7e0   : > { %v3178_v7 = vadd.f32 %v3177_v58, %v3164_v3 }
 0x7e1   : > { %v3189_v44 = vpop.f32.mrf.mxu2  ;;  %v3203_v63 = vpop.f32.mrf.mxu3 }
 0x7e2   : > { %v3190_v2 = vadd.f32 %v3189_v44, %v3176_v42 }
 0x7e4   : > { %v3204_v4 = vadd.f32 %v3203_v63, %v3190_v2  ;;  %v4628_v63 = vld [vmem:[%s5521_s2] ss:$0 sm:$0xff] }
 0x7e6   : > { %v3218_v9 = vadd.f32 %v3217_v37, %v3204_v4 }
 0x7e8   : > { %v3232_v14 = vadd.f32 %v3231_v1, %v3218_v9 }
 0x7e9   : > { %v3191_v16 = vpop.f32.mrf.mxu2  ;;  %v3205_v6 = vpop.f32.mrf.mxu3 }
 0x7ea   : > { %v3192_v11 = vadd.f32 %v3191_v16, %v3178_v7 }
 0x7ec   : > { %v3206_v13 = vadd.f32 %v3205_v6, %v3192_v11 }
 0x7ee   : > { %v3220_v20 = vadd.f32 %v3219_v8, %v3206_v13 }
 0x7f0   : > { %v3234_v22 = vadd.f32 %v3233_v12, %v3220_v20 }
 0x7f5   : > { %v3273_v19 = vpop.f32.mrf.mxu0  ;;  %v3287_v10 = vpop.f32.mrf.mxu1 }
 0x7fd   : > { %v3275_v29 = vpop.f32.mrf.mxu0  ;;  %v3289_v32 = vpop.f32.mrf.mxu1 }
 0x801   : > { %v3245_v28 = vpop.f32.mrf.mxu2  ;;  %v3259_v17 = vpop.f32.mrf.mxu3 }
 0x802   : > { %v3246_v51 = vadd.f32 %v3245_v28, %v3232_v14 }
 0x804   : > { %v3260_v21 = vadd.f32 %v3259_v17, %v3246_v51 }
 0x806   : > { %v3274_v18 = vadd.f32 %v3273_v19, %v3260_v21 }
 0x808   : > { %v3288_v24 = vadd.f32 %v3287_v10, %v3274_v18 }
 0x809   : > { %v3247_v39 = vpop.f32.mrf.mxu2  ;;  %v3261_v5 = vpop.f32.mrf.mxu3 }
 0x80a   : > { %v3248_v25 = vadd.f32 %v3247_v39, %v3234_v22  ;;  %v3292_v26 = vadd.f32 %v3288_v24, %v5182_v30 }
 0x80c   : > { %v3262_v23 = vadd.f32 %v3261_v5, %v3248_v25  ;;  %v3296_v27 = vsel %vm867_vm2, %v3292_v26, 0.0 }
 0x80d   : > { %3297 = vadd.xlane.f32.xlu0 %v3296_v27 }
 0x80e   : > { %v3276_v50 = vadd.f32 %v3275_v29, %v3262_v23 }
 0x810   : > { %v3290_v34 = vadd.f32 %v3289_v32, %v3276_v50 }
 0x812   : > { %v3293_v35 = vadd.f32 %v3290_v34, %v5184_v31 }
 0x814   : > { %v3299_v36 = vsel %vm867_vm2, %v3293_v35, 0.0 }
 0x815   : > { %3300 = vadd.xlane.f32.xlu0 %v3299_v36 }
 0x880   : > { %v3298_v38 = vpop.xlane.xlu0 %3297 }
 0x881   : > { %v3302_v40 = vmul.f32 %v3298_v38, %v5112_v15 }
 0x883   : > { %v3304_v33 = vsub.f32 %v3292_v26, %v3302_v40 }
 0x885   : > { %v3306_v41 = vmul.f32 %v3304_v33, %v3304_v33 }
 0x887   : > { %v3308_v30 = vsel %vm867_vm2, %v3306_v41, 0.0 }
 0x888   : > { %3309 = vadd.xlane.f32.xlu0 %v3308_v30  ;;  %v3301_v43 = vpop.xlane.xlu0 %3300 }
 0x889   : > { %v3303_v45 = vmul.f32 %v3301_v43, %v5112_v15 }
 0x88b   : > { %v3305_v46 = vsub.f32 %v3293_v35, %v3303_v45 }
 0x88d   : > { %v3307_v47 = vmul.f32 %v3305_v46, %v3305_v46 }
 0x88f   : > { %v3311_v48 = vsel %vm867_vm2, %v3307_v47, 0.0 }
 0x890   : > { %3312 = vadd.xlane.f32.xlu0 %v3311_v48 }
 0x8fb   : > { %v3310_v31 = vpop.xlane.xlu0 %3309 }
 0x8fc   : > { %v3314_v49 = vmul.f32 %v3310_v31, %v5112_v15 }
 0x8fe   : > { %v3316_v52 = vadd.f32 1e-05, %v3314_v49 }
 0x900   : > { %4668 = vrsqrt.f32 %v3316_v52  ;;  %vm3324_vm15 = vweird.f32 %v3316_v52 }
 0x903   : > { %v3313_v53 = vpop.xlane.xlu0 %3312 }
 0x904   : > { %v3315_v55 = vmul.f32 %v3313_v53, %v5112_v15 }
 0x906   : > { %v4669_v54 = vpop.eup %4668  ;;  %v3317_v56 = vadd.f32 1e-05, %v3315_v55 }
 0x907   : > { %v3319_v57 = vmul.f32 %v4669_v54, %v3316_v52  ;;  %vm3325_vm14 = vweird.f32 %v4669_v54 }
 0x908   : > { %4670 = vrsqrt.f32 %v3317_v56  ;;  %vm3326_vm0 = vmor %vm3324_vm15, %vm3325_vm14  ;;  %vm3334_vm3 = vweird.f32 %v3317_v56 }
 0x909   : > { %v3320_v58 = vmul.f32 %v4669_v54, %v3319_v57 }
 0x90b   : > { %v3321_v59 = vmul.f32 0.5, %v3320_v58 }
 0x90d   : > { %v3322_v60 = vsub.f32 1.5, %v3321_v59 }
 0x90e   : > { %v4671_v61 = vpop.eup %4670 }
 0x90f   : > { %v3323_v62 = vmul.f32 %v4669_v54, %v3322_v60  ;;  %v3329_v44 = vmul.f32 %v4671_v61, %v3317_v56  ;;  %vm3335_vm1 = vweird.f32 %v4671_v61 }
 0x910   : > { %vm3336_vm4 = vmor %vm3334_vm3, %vm3335_vm1 }
 0x911   : > { %v3327_v15 = vsel %vm3326_vm0, %v4669_v54, %v3323_v62  ;;  %v3330_v37 = vmul.f32 %v4671_v61, %v3329_v44 }
 0x912   : > { %v3338_v42 = vmul.f32 %v3327_v15, %v3304_v33 }
 0x913   : > { %v3331_v1 = vmul.f32 0.5, %v3330_v37 }
 0x914   : > { %v3343_v2 = vmul.f32 %v4628_v63, %v3338_v42 }
 0x915   : > { %v3332_v3 = vsub.f32 1.5, %v3331_v1 }
 0x916   : > { %v3348_v4 = vadd.f32 %v4629_v0, %v3343_v2 }
 0x917   : > { %v3333_v16 = vmul.f32 %v4671_v61, %v3332_v3 }
 0x918   : > { %3350 = vst.msk [vmem:[#allocation2] sm:$0xff] %vm867_vm2, %v3348_v4 }
 0x919   : > { %v3337_v6 = vsel %vm3336_vm4, %v4671_v61, %v3333_v16 }
 0x91a   : > { %v3339_v7 = vmul.f32 %v3337_v6, %v3305_v46 }
 0x91c   : > { %v3344_v8 = vmul.f32 %v4628_v63, %v3339_v7  ;;  %3355 = sbr.rel (%p4356_p5) target bundleno = 2611 (0xa33), region = 108 }
 0x91e   : > { %v3349_v9 = vadd.f32 %v4629_v0, %v3344_v8 }
 0x920   : > { %3351 = vst.msk [vmem:[#allocation2 + $0x8] sm:$0xff] %vm867_vm2, %v3349_v9 }
 0x921   : > { %v4572_v11 = vld [vmem:[%s5523_s29 + $0x8] sm:$0xff]  ;;  %v3357_v12 = vrot.slane %v3348_v4, 7  ;;  %v3360_v13 = vrot.slane %v3349_v9, 6  ;;  %vm3362_vm5 = vcmask 1040384   ;;  %v4580_v14 = vld [vmem:[%s5524_s24 + $0x38] sm:$0xff]  ;;  %v4571_v28 = vld [vmem:[%s5523_s29] sm:$0xff] }
 0x922   : > { %3394 = vmatpush.bf16.msra.mxu0 %v4572_v11  ;;  %3471 = vmatpush.bf16.msra.mxu1 %v4580_v14  ;;  %v4579_v51 = vld [vmem:[%s5524_s24 + $0x30] sm:$0xff]  ;;  %v4578_v20 = vld [vmem:[%s5524_s24 + $0x28] sm:$0xff]  ;;  %v4577_v21 = vld [vmem:[%s5524_s24 + $0x20] sm:$0xff] }
 0x923   : > { %v3363_v17 = vsel %vm3362_vm5, %v3357_v12, %v3360_v13  ;;  %v4576_v10 = vld [vmem:[%s5524_s24 + $0x18] sm:$0xff]  ;;  %v4575_v18 = vld [vmem:[%s5524_s24 + $0x10] sm:$0xff]  ;;  %v4574_v22 = vld [vmem:[%s5524_s24 + $0x8] sm:$0xff] }
 0x924   : > { %v3364_v19 = vpack.c.bf16 %v3363_v17, %v3363_v17  ;;  %v4573_v24 = vld [vmem:[%s5524_s24] sm:$0xff] }
 0x925   : > { %v4672_v39 = vld [vmem:[%s5525_s3] ss:$0 sm:$0xff] }
 0x926   : > { %3395 = vmatpush.bf16.msra.mxu0 %v4571_v28  ;;  %3472 = vmatpush.bf16.msra.mxu1 %v4579_v51  ;;  %v4673_v29 = vld [vmem:[%s5526_s21] ss:$0 sm:$0xff] }
 0x929   : > { %4365 = vmatmul.msk.bf16.vlgmr.msra.gmra.mxu0 %vm867_vm2, %v3364_v19  ;;  %vm3484_vm2 = vcmask 58368  }
 0x92a   : > { %3473 = vmatpush.bf16.msra.mxu1 %v4578_v20 }
 0x92e   : > { %3474 = vmatpush.bf16.msra.mxu1 %v4577_v21 }
 0x932   : > { %3475 = vmatpush.bf16.msra.mxu1 %v4576_v10 }
 0x936   : > { %3476 = vmatpush.bf16.msra.mxu1 %v4575_v18 }
 0x93a   : > { %3477 = vmatpush.bf16.msra.mxu1 %v4574_v22 }
 0x93e   : > { %3478 = vmatpush.bf16.msra.mxu1 %v4573_v24 }
 0x9a6   : > { %v3397_v25 = vpop.f32.mrf.mxu0 }
 0x9a7   : > { %v3398_v26 = vadd.f32 %v4672_v39, %v3397_v25 }
 0x9a9   : > { %v3401_v5 = vmax.f32 %v3398_v26, 0.0 }
 0x9ab   : > { %v3402_v23 = vpack.c.bf16 %v3401_v5, %v3401_v5 }
 0x9ad   : > { %3479 = vmatmul.bf16.vlgmr.msra.gmra.mxu1 %v3402_v23 }
 0x9ae   : > { %v3399_v27 = vpop.f32.mrf.mxu0 }
 0xa2a   : > { %v3480_v50 = vpop.f32.mrf.mxu1 }
 0xa2b   : > { %v3481_v32 = vadd.f32 %v4673_v29, %v3480_v50 }
 0xa2d   : > { %3485 = vst.msk [vmem:[#allocation3] sm:$0x3] %vm3484_vm2, %v3481_v32 }
 0xa32   : > { %v3482_v34 = vpop.f32.mrf.mxu1 }
 0xa33 PF: > { %p4585_p6 = scmp.eq.s32.totalorder %s4835_s22, 1  ;;  %s4723_s26 = smov [#allocation3]  }
 0xa34   : > { %s3492_s16 = sshll.u32 %s4723_s26, 4  ;;  %s5527_s27 = sld [smem:[#allocation18_spill]]  ;;  %s3493_s16 = int_to_ptr.vmem [resolvable:$true] %s3492_s16 }
 0xa3a   : > { %s3494_s0 = sshll.u32 %s5527_s27, 4  ;;  %s3495_s0 = int_to_ptr.hbm [resolvable:$true] %s3494_s0 }
 0xa3b   : > { %4582 = dma.vmem_to_hbm [thread:$0]  (%p4585_p6), %s3493_s16, 32, %s3495_s0, [#allocation4]  }
 0xa3c   : > { %4707 = dma.done.wait (%p4585_p6), [#allocation4], 32  }
 0xa3d   : > { %4709 = vsyncadd (%p4585_p6), [#allocation4], 4294967264 }
 0xa3e PF: > { %s5528_s23 = sld [smem:[#allocation6_spill]] }
 0xa44   : > { %s31_s1 = sadd.s32 1, %s5528_s23  }
 0xa45   : > { %p28_p7 = scmp.ge.s32.totalorder %s31_s1, 4  }
 0xa47   :  { %30 = sbr.rel (!%p28_p7) target bundleno = 13 (0xd), region = 170 }
 0xa4c   :  { %3508 = vsyncpa [#allocation4], 1 }
 0xa4d   :  { %3510 = vsyncpa [#allocation4 + $0x1], 1 }

</bundles_post_ra>
